<compile_context>
chip_gen: v7x
topology: tpu7x:2x2x1
jax: 0.10.0
libtpu: 0.0.40
codegen_flags: <defaults>
</compile_context>

<pallas_src>
import jax
import jax.numpy as jnp
from jax.experimental import pallas as pl
from jax.experimental.pallas import tpu as pltpu

P = 128  # lane padding for every feature dimension


def _vmem():
    return pl.BlockSpec(memory_space=pltpu.MemorySpace.VMEM)


# ----------------------------- fused kernel ----------------------------------
def fused_kernel(dev_lens_ref, evt_lens_ref,
                 eng_ref, num_ref, evt_ref, desc_ref,
                 wih_da_ref, wih_db_ref, whh_d_ref, b_d_ref,
                 wih_e_ref, whh_e_ref, b_e_ref,
                 w1a_ref, w1b_ref, w1c_ref, b1_ref,
                 w2_ref, b2_ref, w3_ref, b3_ref,
                 out_ref):
    f32 = jnp.float32
    Sd, Bp, _ = eng_ref.shape
    Se = evt_ref.shape[0]

    # ---------------- device RNN branch ----------------
    # hoisted input projection: one matmul over all timesteps
    eng2 = eng_ref[...].reshape(Sd * Bp, P)
    num2 = num_ref[...].reshape(Sd * Bp, P)
    xw_d = (jnp.dot(eng2, wih_da_ref[...], preferred_element_type=f32)
            + jnp.dot(num2, wih_db_ref[...], preferred_element_type=f32)
            + b_d_ref[...])                                   # [Sd*Bp, P]
    whh_d = whh_d_ref[...]
    dlm1 = dev_lens_ref[...] - 1                              # [Bp, 1] int32

    h = jnp.zeros((Bp, P), f32)
    dev_out = jnp.zeros((Bp, P), f32)
    for t in range(Sd):                                       # fully unrolled
        h = jnp.tanh(xw_d[t * Bp:(t + 1) * Bp, :]
                     + jnp.dot(h, whh_d, preferred_element_type=f32))
        dev_out = jnp.where(dlm1 == t, h, dev_out)

    # ---------------- event RNN branch ----------------
    evt2 = evt_ref[...].reshape(Se * Bp, P)
    xw_e = (jnp.dot(evt2, wih_e_ref[...], preferred_element_type=f32)
            + b_e_ref[...])                                   # [Se*Bp, P]
    whh_e = whh_e_ref[...]
    elm1 = evt_lens_ref[...] - 1

    h = jnp.zeros((Bp, P), f32)
    evt_out = jnp.zeros((Bp, P), f32)
    for t in range(Se):                                       # fully unrolled
        h = jnp.tanh(xw_e[t * Bp:(t + 1) * Bp, :]
                     + jnp.dot(h, whh_e, preferred_element_type=f32))
        evt_out = jnp.where(elm1 == t, h, evt_out)

    # ---------------- description max-pool ----------------
    # (no length mask, matching the PyTorch module)
    desc_max = jnp.max(desc_ref[...], axis=1)                 # [Bp, P]

    # ---------------- MLP head (split W1 instead of concat) ----------------
    h1 = jnp.maximum(
        jnp.dot(dev_out, w1a_ref[...], preferred_element_type=f32)
        + jnp.dot(evt_out, w1b_ref[...], preferred_element_type=f32)
        + jnp.dot(desc_max, w1c_ref[...], preferred_element_type=f32)
        + b1_ref[...], 0.0)
    h2 = jnp.maximum(
        jnp.dot(h1, w2_ref[...], preferred_element_type=f32) + b2_ref[...],
        0.0)
    logit = jnp.dot(h2, w3_ref[...], preferred_element_type=f32) + b3_ref[...]
    out_ref[...] = jax.nn.sigmoid(logit)                      # [Bp, 1]


def fused_forward(dev_lens, evt_lens, eng_tm, num_tm, evt_tm, desc_x, *weights):
    Bp = dev_lens.shape[0]
    n_in = 6 + len(weights)
    return pl.pallas_call(
        fused_kernel,
        out_shape=jax.ShapeDtypeStruct((Bp, 1), jnp.float32),
        in_specs=[_vmem()] * n_in,
        out_specs=_vmem(),
    )(dev_lens, evt_lens, eng_tm, num_tm, evt_tm, desc_x, *weights)


# ------------------------------- parameters ----------------------------------
def _padded_normal(key, real_shape, padded_shape, scale=0.1):
    """Random normal weights in the top-left corner of a zero-padded slab."""
    w = jax.random.normal(key, real_shape, jnp.float32) * scale
    z = jnp.zeros(padded_shape, jnp.float32)
    return z.at[tuple(slice(0, d) for d in real_shape)].set(w)


def init_params(key, vocab=100, d_eng=16, d_num=16,
                event_hidden=32, desc_hidden=32, hidden=32):
    ks = jax.random.split(key, 19)
    r = _padded_normal
    return {
        "deviceEng_emb": r(ks[0], (vocab, d_eng), (vocab, P)),
        "deviceNum_emb": r(ks[1], (vocab, d_num), (vocab, P)),
        "event_emb":     r(ks[2], (vocab, event_hidden), (vocab, P)),
        "desc_emb":      r(ks[3], (vocab, desc_hidden), (vocab, P)),
        # device RNN: W_ih split per-embedding (eng half / num half), W_hh,
        # combined bias b = b_ih + b_hh.
        "dev_rnn": (r(ks[4], (d_eng, hidden), (P, P)),
                    r(ks[5], (d_num, hidden), (P, P)),
                    r(ks[6], (hidden, hidden), (P, P)),
                    r(ks[7], (1, hidden), (1, P))),
        # event RNN
        "evt_rnn": (r(ks[8], (event_hidden, hidden), (P, P)),
                    r(ks[9], (hidden, hidden), (P, P)),
                    r(ks[10], (1, hidden), (1, P))),
        # MLP: W1 split into (device, event, desc) row blocks to avoid concat
        "mlp": (r(ks[11], (hidden, hidden), (P, P)),
                r(ks[12], (hidden, hidden), (P, P)),
                r(ks[13], (desc_hidden, hidden), (P, P)),
                r(ks[14], (1, hidden), (1, P)),
                r(ks[15], (hidden, hidden), (P, P)),
                r(ks[16], (1, hidden), (1, P)),
                r(ks[17], (hidden, 1), (P, 1)),
                r(ks[18], (1, 1), (1, 1))),
    }


# -------------------------------- forward ------------------------------------
def model_forward(params, deviceEng, deviceNum, eventID,
                  deviceLength, eventLength, description):
    B = deviceEng.shape[0]
    Bp = ((B + 7) // 8) * 8
    padB = Bp - B

    def pad_b(x, fill=0):
        if padB == 0:
            return x
        cfg = [(0, padB)] + [(0, 0)] * (x.ndim - 1)
        return jnp.pad(x, cfg, constant_values=fill)

    dEng = pad_b(deviceEng)
    dNum = pad_b(deviceNum)
    eID = pad_b(eventID)
    desc = pad_b(description)
    dev_lens = pad_b(deviceLength.astype(jnp.int32), fill=1).reshape(Bp, 1)
    evt_lens = pad_b(eventLength.astype(jnp.int32), fill=1).reshape(Bp, 1)

    # Embedding lookups (jitted XLA glue around the single fused kernel).
    eng_x = params["deviceEng_emb"][dEng]        # [Bp, Sd, P]
    num_x = params["deviceNum_emb"][dNum]        # [Bp, Sd, P]
    evt_x = params["event_emb"][eID]             # [Bp, Se, P]
    desc_x = params["desc_emb"][desc]            # [Bp, Sx, P]

    # time-major for the recurrences
    eng_tm = jnp.transpose(eng_x, (1, 0, 2))     # [Sd, Bp, P]
    num_tm = jnp.transpose(num_x, (1, 0, 2))     # [Sd, Bp, P]
    evt_tm = jnp.transpose(evt_x, (1, 0, 2))     # [Se, Bp, P]

    out = fused_forward(dev_lens, evt_lens, eng_tm, num_tm, evt_tm, desc_x,
                        *params["dev_rnn"], *params["evt_rnn"],
                        *params["mlp"])          # [Bp, 1]
    return out[:B, 0]                            # [B]


if __name__ == "__main__":
    key = jax.random.PRNGKey(0)
    k_param, k_eng, k_num, k_evt, k_desc, k_dl, k_el = jax.random.split(key, 7)

    B, S_dev, S_evt, S_desc, vocab = 4, 8, 8, 8, 100
    params = init_params(k_param, vocab=vocab)

    deviceEng = jax.random.randint(k_eng, (B, S_dev), 0, vocab, jnp.int32)
    deviceNum = jax.random.randint(k_num, (B, S_dev), 0, vocab, jnp.int32)
    eventID = jax.random.randint(k_evt, (B, S_evt), 0, vocab, jnp.int32)
    description = jax.random.randint(k_desc, (B, S_desc), 0, vocab, jnp.int32)
    deviceLength = jax.random.randint(k_dl, (B,), 1, S_dev + 1, jnp.int32)
    eventLength = jax.random.randint(k_el, (B,), 1, S_evt + 1, jnp.int32)

    fwd = jax.jit(model_forward)
    out = fwd(params, deviceEng, deviceNum, eventID,
              deviceLength, eventLength, description)
    jax.block_until_ready(out)
    assert out.shape == (B,)
    print("KERNEL_OK")
</pallas_src>

<mosaic_0001>
module attributes {stable_mosaic.version = 11 : i64} {
  func.func @fused_kernel(%arg0: memref<8x1xi32, #tpu.memory_space<vmem>>, %arg1: memref<8x1xi32, #tpu.memory_space<vmem>>, %arg2: memref<8x8x128xf32, #tpu.memory_space<vmem>>, %arg3: memref<8x8x128xf32, #tpu.memory_space<vmem>>, %arg4: memref<8x8x128xf32, #tpu.memory_space<vmem>>, %arg5: memref<8x8x128xf32, #tpu.memory_space<vmem>>, %arg6: memref<128x128xf32, #tpu.memory_space<vmem>>, %arg7: memref<128x128xf32, #tpu.memory_space<vmem>>, %arg8: memref<128x128xf32, #tpu.memory_space<vmem>>, %arg9: memref<1x128xf32, #tpu.memory_space<vmem>>, %arg10: memref<128x128xf32, #tpu.memory_space<vmem>>, %arg11: memref<128x128xf32, #tpu.memory_space<vmem>>, %arg12: memref<1x128xf32, #tpu.memory_space<vmem>>, %arg13: memref<128x128xf32, #tpu.memory_space<vmem>>, %arg14: memref<128x128xf32, #tpu.memory_space<vmem>>, %arg15: memref<128x128xf32, #tpu.memory_space<vmem>>, %arg16: memref<1x128xf32, #tpu.memory_space<vmem>>, %arg17: memref<128x128xf32, #tpu.memory_space<vmem>>, %arg18: memref<1x128xf32, #tpu.memory_space<vmem>>, %arg19: memref<128x1xf32, #tpu.memory_space<vmem>>, %arg20: memref<1x1xf32, #tpu.memory_space<vmem>>, %arg21: memref<8x1xf32, #tpu.memory_space<vmem>>) attributes {dimension_semantics = [], scalar_prefetch = 0 : i64, scratch_operands = 0 : i64, tpu.core_type = #tpu.core_type<tc>} {
    %c0 = arith.constant 0 : index
    %c0_0 = arith.constant 0 : index
    %c0_1 = arith.constant 0 : index
    %0 = vector.load %arg2[%c0, %c0_0, %c0_1] : memref<8x8x128xf32, #tpu.memory_space<vmem>>, vector<8x8x128xf32>
    %1 = vector.shape_cast %0 : vector<8x8x128xf32> to vector<64x128xf32>
    %c0_2 = arith.constant 0 : index
    %c0_3 = arith.constant 0 : index
    %c0_4 = arith.constant 0 : index
    %2 = vector.load %arg3[%c0_2, %c0_3, %c0_4] : memref<8x8x128xf32, #tpu.memory_space<vmem>>, vector<8x8x128xf32>
    %3 = vector.shape_cast %2 : vector<8x8x128xf32> to vector<64x128xf32>
    %c0_5 = arith.constant 0 : index
    %c0_6 = arith.constant 0 : index
    %4 = vector.load %arg6[%c0_5, %c0_6] : memref<128x128xf32, #tpu.memory_space<vmem>>, vector<128x128xf32>
    %cst = arith.constant dense<0.000000e+00> : vector<64x128xf32>
    %5 = tpu.matmul %1, %4, %cst {dimension_numbers = #tpu.dot_dimension_numbers<[1], [0], [0], [1], [0, 0, 1, 1], [], []>} : vector<64x128xf32>, vector<128x128xf32>, vector<64x128xf32> -> vector<64x128xf32>
    %c0_7 = arith.constant 0 : index
    %c0_8 = arith.constant 0 : index
    %6 = vector.load %arg7[%c0_7, %c0_8] : memref<128x128xf32, #tpu.memory_space<vmem>>, vector<128x128xf32>
    %cst_9 = arith.constant dense<0.000000e+00> : vector<64x128xf32>
    %7 = tpu.matmul %3, %6, %cst_9 {dimension_numbers = #tpu.dot_dimension_numbers<[1], [0], [0], [1], [0, 0, 1, 1], [], []>} : vector<64x128xf32>, vector<128x128xf32>, vector<64x128xf32> -> vector<64x128xf32>
    %8 = arith.addf %5, %7 : vector<64x128xf32>
    %c0_10 = arith.constant 0 : index
    %c0_11 = arith.constant 0 : index
    %9 = vector.load %arg9[%c0_10, %c0_11] : memref<1x128xf32, #tpu.memory_space<vmem>>, vector<1x128xf32>
    %10 = vector.broadcast %9 : vector<1x128xf32> to vector<64x128xf32>
    %11 = arith.addf %8, %10 : vector<64x128xf32>
    %c0_12 = arith.constant 0 : index
    %c0_13 = arith.constant 0 : index
    %12 = vector.load %arg8[%c0_12, %c0_13] : memref<128x128xf32, #tpu.memory_space<vmem>>, vector<128x128xf32>
    %c0_14 = arith.constant 0 : index
    %c0_15 = arith.constant 0 : index
    %13 = vector.load %arg0[%c0_14, %c0_15] : memref<8x1xi32, #tpu.memory_space<vmem>>, vector<8x1xi32>
    %c1_i32 = arith.constant 1 : i32
    %14 = vector.broadcast %c1_i32 : i32 to vector<8x1xi32>
    %15 = arith.subi %13, %14 : vector<8x1xi32>
    %cst_16 = arith.constant 0.000000e+00 : f32
    %16 = vector.broadcast %cst_16 : f32 to vector<8x128xf32>
    %cst_17 = arith.constant 0.000000e+00 : f32
    %17 = vector.broadcast %cst_17 : f32 to vector<8x128xf32>
    %18 = vector.extract_strided_slice %11 {offsets = [0, 0], sizes = [8, 128], strides = [1, 1]} : vector<64x128xf32> to vector<8x128xf32>
    %cst_18 = arith.constant dense<0.000000e+00> : vector<8x128xf32>
    %19 = tpu.matmul %16, %12, %cst_18 {dimension_numbers = #tpu.dot_dimension_numbers<[1], [0], [0], [1], [0, 0, 1, 1], [], []>} : vector<8x128xf32>, vector<128x128xf32>, vector<8x128xf32> -> vector<8x128xf32>
    %20 = arith.addf %18, %19 : vector<8x128xf32>
    %21 = math.tanh %20 : vector<8x128xf32>
    %c0_i32 = arith.constant 0 : i32
    %22 = vector.broadcast %c0_i32 : i32 to vector<8x1xi32>
    %23 = arith.cmpi eq, %15, %22 : vector<8x1xi32>
    %24 = vector.shape_cast %23 : vector<8x1xi1> to vector<8x1xi1>
    %25 = vector.broadcast %24 : vector<8x1xi1> to vector<8x128xi1>
    %26 = arith.select %25, %21, %17 : vector<8x128xi1>, vector<8x128xf32>
    %27 = vector.extract_strided_slice %11 {offsets = [8, 0], sizes = [8, 128], strides = [1, 1]} : vector<64x128xf32> to vector<8x128xf32>
    %cst_19 = arith.constant dense<0.000000e+00> : vector<8x128xf32>
    %28 = tpu.matmul %21, %12, %cst_19 {dimension_numbers = #tpu.dot_dimension_numbers<[1], [0], [0], [1], [0, 0, 1, 1], [], []>} : vector<8x128xf32>, vector<128x128xf32>, vector<8x128xf32> -> vector<8x128xf32>
    %29 = arith.addf %27, %28 : vector<8x128xf32>
    %30 = math.tanh %29 : vector<8x128xf32>
    %c1_i32_20 = arith.constant 1 : i32
    %31 = vector.broadcast %c1_i32_20 : i32 to vector<8x1xi32>
    %32 = arith.cmpi eq, %15, %31 : vector<8x1xi32>
    %33 = vector.shape_cast %32 : vector<8x1xi1> to vector<8x1xi1>
    %34 = vector.broadcast %33 : vector<8x1xi1> to vector<8x128xi1>
    %35 = arith.select %34, %30, %26 : vector<8x128xi1>, vector<8x128xf32>
    %36 = vector.extract_strided_slice %11 {offsets = [16, 0], sizes = [8, 128], strides = [1, 1]} : vector<64x128xf32> to vector<8x128xf32>
    %cst_21 = arith.constant dense<0.000000e+00> : vector<8x128xf32>
    %37 = tpu.matmul %30, %12, %cst_21 {dimension_numbers = #tpu.dot_dimension_numbers<[1], [0], [0], [1], [0, 0, 1, 1], [], []>} : vector<8x128xf32>, vector<128x128xf32>, vector<8x128xf32> -> vector<8x128xf32>
    %38 = arith.addf %36, %37 : vector<8x128xf32>
    %39 = math.tanh %38 : vector<8x128xf32>
    %c2_i32 = arith.constant 2 : i32
    %40 = vector.broadcast %c2_i32 : i32 to vector<8x1xi32>
    %41 = arith.cmpi eq, %15, %40 : vector<8x1xi32>
    %42 = vector.shape_cast %41 : vector<8x1xi1> to vector<8x1xi1>
    %43 = vector.broadcast %42 : vector<8x1xi1> to vector<8x128xi1>
    %44 = arith.select %43, %39, %35 : vector<8x128xi1>, vector<8x128xf32>
    %45 = vector.extract_strided_slice %11 {offsets = [24, 0], sizes = [8, 128], strides = [1, 1]} : vector<64x128xf32> to vector<8x128xf32>
    %cst_22 = arith.constant dense<0.000000e+00> : vector<8x128xf32>
    %46 = tpu.matmul %39, %12, %cst_22 {dimension_numbers = #tpu.dot_dimension_numbers<[1], [0], [0], [1], [0, 0, 1, 1], [], []>} : vector<8x128xf32>, vector<128x128xf32>, vector<8x128xf32> -> vector<8x128xf32>
    %47 = arith.addf %45, %46 : vector<8x128xf32>
    %48 = math.tanh %47 : vector<8x128xf32>
    %c3_i32 = arith.constant 3 : i32
    %49 = vector.broadcast %c3_i32 : i32 to vector<8x1xi32>
    %50 = arith.cmpi eq, %15, %49 : vector<8x1xi32>
    %51 = vector.shape_cast %50 : vector<8x1xi1> to vector<8x1xi1>
    %52 = vector.broadcast %51 : vector<8x1xi1> to vector<8x128xi1>
    %53 = arith.select %52, %48, %44 : vector<8x128xi1>, vector<8x128xf32>
    %54 = vector.extract_strided_slice %11 {offsets = [32, 0], sizes = [8, 128], strides = [1, 1]} : vector<64x128xf32> to vector<8x128xf32>
    %cst_23 = arith.constant dense<0.000000e+00> : vector<8x128xf32>
    %55 = tpu.matmul %48, %12, %cst_23 {dimension_numbers = #tpu.dot_dimension_numbers<[1], [0], [0], [1], [0, 0, 1, 1], [], []>} : vector<8x128xf32>, vector<128x128xf32>, vector<8x128xf32> -> vector<8x128xf32>
    %56 = arith.addf %54, %55 : vector<8x128xf32>
    %57 = math.tanh %56 : vector<8x128xf32>
    %c4_i32 = arith.constant 4 : i32
    %58 = vector.broadcast %c4_i32 : i32 to vector<8x1xi32>
    %59 = arith.cmpi eq, %15, %58 : vector<8x1xi32>
    %60 = vector.shape_cast %59 : vector<8x1xi1> to vector<8x1xi1>
    %61 = vector.broadcast %60 : vector<8x1xi1> to vector<8x128xi1>
    %62 = arith.select %61, %57, %53 : vector<8x128xi1>, vector<8x128xf32>
    %63 = vector.extract_strided_slice %11 {offsets = [40, 0], sizes = [8, 128], strides = [1, 1]} : vector<64x128xf32> to vector<8x128xf32>
    %cst_24 = arith.constant dense<0.000000e+00> : vector<8x128xf32>
    %64 = tpu.matmul %57, %12, %cst_24 {dimension_numbers = #tpu.dot_dimension_numbers<[1], [0], [0], [1], [0, 0, 1, 1], [], []>} : vector<8x128xf32>, vector<128x128xf32>, vector<8x128xf32> -> vector<8x128xf32>
    %65 = arith.addf %63, %64 : vector<8x128xf32>
    %66 = math.tanh %65 : vector<8x128xf32>
    %c5_i32 = arith.constant 5 : i32
    %67 = vector.broadcast %c5_i32 : i32 to vector<8x1xi32>
    %68 = arith.cmpi eq, %15, %67 : vector<8x1xi32>
    %69 = vector.shape_cast %68 : vector<8x1xi1> to vector<8x1xi1>
    %70 = vector.broadcast %69 : vector<8x1xi1> to vector<8x128xi1>
    %71 = arith.select %70, %66, %62 : vector<8x128xi1>, vector<8x128xf32>
    %72 = vector.extract_strided_slice %11 {offsets = [48, 0], sizes = [8, 128], strides = [1, 1]} : vector<64x128xf32> to vector<8x128xf32>
    %cst_25 = arith.constant dense<0.000000e+00> : vector<8x128xf32>
    %73 = tpu.matmul %66, %12, %cst_25 {dimension_numbers = #tpu.dot_dimension_numbers<[1], [0], [0], [1], [0, 0, 1, 1], [], []>} : vector<8x128xf32>, vector<128x128xf32>, vector<8x128xf32> -> vector<8x128xf32>
    %74 = arith.addf %72, %73 : vector<8x128xf32>
    %75 = math.tanh %74 : vector<8x128xf32>
    %c6_i32 = arith.constant 6 : i32
    %76 = vector.broadcast %c6_i32 : i32 to vector<8x1xi32>
    %77 = arith.cmpi eq, %15, %76 : vector<8x1xi32>
    %78 = vector.shape_cast %77 : vector<8x1xi1> to vector<8x1xi1>
    %79 = vector.broadcast %78 : vector<8x1xi1> to vector<8x128xi1>
    %80 = arith.select %79, %75, %71 : vector<8x128xi1>, vector<8x128xf32>
    %81 = vector.extract_strided_slice %11 {offsets = [56, 0], sizes = [8, 128], strides = [1, 1]} : vector<64x128xf32> to vector<8x128xf32>
    %cst_26 = arith.constant dense<0.000000e+00> : vector<8x128xf32>
    %82 = tpu.matmul %75, %12, %cst_26 {dimension_numbers = #tpu.dot_dimension_numbers<[1], [0], [0], [1], [0, 0, 1, 1], [], []>} : vector<8x128xf32>, vector<128x128xf32>, vector<8x128xf32> -> vector<8x128xf32>
    %83 = arith.addf %81, %82 : vector<8x128xf32>
    %84 = math.tanh %83 : vector<8x128xf32>
    %c7_i32 = arith.constant 7 : i32
    %85 = vector.broadcast %c7_i32 : i32 to vector<8x1xi32>
    %86 = arith.cmpi eq, %15, %85 : vector<8x1xi32>
    %87 = vector.shape_cast %86 : vector<8x1xi1> to vector<8x1xi1>
    %88 = vector.broadcast %87 : vector<8x1xi1> to vector<8x128xi1>
    %89 = arith.select %88, %84, %80 : vector<8x128xi1>, vector<8x128xf32>
    %c0_27 = arith.constant 0 : index
    %c0_28 = arith.constant 0 : index
    %c0_29 = arith.constant 0 : index
    %90 = vector.load %arg4[%c0_27, %c0_28, %c0_29] : memref<8x8x128xf32, #tpu.memory_space<vmem>>, vector<8x8x128xf32>
    %91 = vector.shape_cast %90 : vector<8x8x128xf32> to vector<64x128xf32>
    %c0_30 = arith.constant 0 : index
    %c0_31 = arith.constant 0 : index
    %92 = vector.load %arg10[%c0_30, %c0_31] : memref<128x128xf32, #tpu.memory_space<vmem>>, vector<128x128xf32>
    %cst_32 = arith.constant dense<0.000000e+00> : vector<64x128xf32>
    %93 = tpu.matmul %91, %92, %cst_32 {dimension_numbers = #tpu.dot_dimension_numbers<[1], [0], [0], [1], [0, 0, 1, 1], [], []>} : vector<64x128xf32>, vector<128x128xf32>, vector<64x128xf32> -> vector<64x128xf32>
    %c0_33 = arith.constant 0 : index
    %c0_34 = arith.constant 0 : index
    %94 = vector.load %arg12[%c0_33, %c0_34] : memref<1x128xf32, #tpu.memory_space<vmem>>, vector<1x128xf32>
    %95 = vector.broadcast %94 : vector<1x128xf32> to vector<64x128xf32>
    %96 = arith.addf %93, %95 : vector<64x128xf32>
    %c0_35 = arith.constant 0 : index
    %c0_36 = arith.constant 0 : index
    %97 = vector.load %arg11[%c0_35, %c0_36] : memref<128x128xf32, #tpu.memory_space<vmem>>, vector<128x128xf32>
    %c0_37 = arith.constant 0 : index
    %c0_38 = arith.constant 0 : index
    %98 = vector.load %arg1[%c0_37, %c0_38] : memref<8x1xi32, #tpu.memory_space<vmem>>, vector<8x1xi32>
    %c1_i32_39 = arith.constant 1 : i32
    %99 = vector.broadcast %c1_i32_39 : i32 to vector<8x1xi32>
    %100 = arith.subi %98, %99 : vector<8x1xi32>
    %cst_40 = arith.constant 0.000000e+00 : f32
    %101 = vector.broadcast %cst_40 : f32 to vector<8x128xf32>
    %cst_41 = arith.constant 0.000000e+00 : f32
    %102 = vector.broadcast %cst_41 : f32 to vector<8x128xf32>
    %103 = vector.extract_strided_slice %96 {offsets = [0, 0], sizes = [8, 128], strides = [1, 1]} : vector<64x128xf32> to vector<8x128xf32>
    %cst_42 = arith.constant dense<0.000000e+00> : vector<8x128xf32>
    %104 = tpu.matmul %101, %97, %cst_42 {dimension_numbers = #tpu.dot_dimension_numbers<[1], [0], [0], [1], [0, 0, 1, 1], [], []>} : vector<8x128xf32>, vector<128x128xf32>, vector<8x128xf32> -> vector<8x128xf32>
    %105 = arith.addf %103, %104 : vector<8x128xf32>
    %106 = math.tanh %105 : vector<8x128xf32>
    %c0_i32_43 = arith.constant 0 : i32
    %107 = vector.broadcast %c0_i32_43 : i32 to vector<8x1xi32>
    %108 = arith.cmpi eq, %100, %107 : vector<8x1xi32>
    %109 = vector.shape_cast %108 : vector<8x1xi1> to vector<8x1xi1>
    %110 = vector.broadcast %109 : vector<8x1xi1> to vector<8x128xi1>
    %111 = arith.select %110, %106, %102 : vector<8x128xi1>, vector<8x128xf32>
    %112 = vector.extract_strided_slice %96 {offsets = [8, 0], sizes = [8, 128], strides = [1, 1]} : vector<64x128xf32> to vector<8x128xf32>
    %cst_44 = arith.constant dense<0.000000e+00> : vector<8x128xf32>
    %113 = tpu.matmul %106, %97, %cst_44 {dimension_numbers = #tpu.dot_dimension_numbers<[1], [0], [0], [1], [0, 0, 1, 1], [], []>} : vector<8x128xf32>, vector<128x128xf32>, vector<8x128xf32> -> vector<8x128xf32>
    %114 = arith.addf %112, %113 : vector<8x128xf32>
    %115 = math.tanh %114 : vector<8x128xf32>
    %c1_i32_45 = arith.constant 1 : i32
    %116 = vector.broadcast %c1_i32_45 : i32 to vector<8x1xi32>
    %117 = arith.cmpi eq, %100, %116 : vector<8x1xi32>
    %118 = vector.shape_cast %117 : vector<8x1xi1> to vector<8x1xi1>
    %119 = vector.broadcast %118 : vector<8x1xi1> to vector<8x128xi1>
    %120 = arith.select %119, %115, %111 : vector<8x128xi1>, vector<8x128xf32>
    %121 = vector.extract_strided_slice %96 {offsets = [16, 0], sizes = [8, 128], strides = [1, 1]} : vector<64x128xf32> to vector<8x128xf32>
    %cst_46 = arith.constant dense<0.000000e+00> : vector<8x128xf32>
    %122 = tpu.matmul %115, %97, %cst_46 {dimension_numbers = #tpu.dot_dimension_numbers<[1], [0], [0], [1], [0, 0, 1, 1], [], []>} : vector<8x128xf32>, vector<128x128xf32>, vector<8x128xf32> -> vector<8x128xf32>
    %123 = arith.addf %121, %122 : vector<8x128xf32>
    %124 = math.tanh %123 : vector<8x128xf32>
    %c2_i32_47 = arith.constant 2 : i32
    %125 = vector.broadcast %c2_i32_47 : i32 to vector<8x1xi32>
    %126 = arith.cmpi eq, %100, %125 : vector<8x1xi32>
    %127 = vector.shape_cast %126 : vector<8x1xi1> to vector<8x1xi1>
    %128 = vector.broadcast %127 : vector<8x1xi1> to vector<8x128xi1>
    %129 = arith.select %128, %124, %120 : vector<8x128xi1>, vector<8x128xf32>
    %130 = vector.extract_strided_slice %96 {offsets = [24, 0], sizes = [8, 128], strides = [1, 1]} : vector<64x128xf32> to vector<8x128xf32>
    %cst_48 = arith.constant dense<0.000000e+00> : vector<8x128xf32>
    %131 = tpu.matmul %124, %97, %cst_48 {dimension_numbers = #tpu.dot_dimension_numbers<[1], [0], [0], [1], [0, 0, 1, 1], [], []>} : vector<8x128xf32>, vector<128x128xf32>, vector<8x128xf32> -> vector<8x128xf32>
    %132 = arith.addf %130, %131 : vector<8x128xf32>
    %133 = math.tanh %132 : vector<8x128xf32>
    %c3_i32_49 = arith.constant 3 : i32
    %134 = vector.broadcast %c3_i32_49 : i32 to vector<8x1xi32>
    %135 = arith.cmpi eq, %100, %134 : vector<8x1xi32>
    %136 = vector.shape_cast %135 : vector<8x1xi1> to vector<8x1xi1>
    %137 = vector.broadcast %136 : vector<8x1xi1> to vector<8x128xi1>
    %138 = arith.select %137, %133, %129 : vector<8x128xi1>, vector<8x128xf32>
    %139 = vector.extract_strided_slice %96 {offsets = [32, 0], sizes = [8, 128], strides = [1, 1]} : vector<64x128xf32> to vector<8x128xf32>
    %cst_50 = arith.constant dense<0.000000e+00> : vector<8x128xf32>
    %140 = tpu.matmul %133, %97, %cst_50 {dimension_numbers = #tpu.dot_dimension_numbers<[1], [0], [0], [1], [0, 0, 1, 1], [], []>} : vector<8x128xf32>, vector<128x128xf32>, vector<8x128xf32> -> vector<8x128xf32>
    %141 = arith.addf %139, %140 : vector<8x128xf32>
    %142 = math.tanh %141 : vector<8x128xf32>
    %c4_i32_51 = arith.constant 4 : i32
    %143 = vector.broadcast %c4_i32_51 : i32 to vector<8x1xi32>
    %144 = arith.cmpi eq, %100, %143 : vector<8x1xi32>
    %145 = vector.shape_cast %144 : vector<8x1xi1> to vector<8x1xi1>
    %146 = vector.broadcast %145 : vector<8x1xi1> to vector<8x128xi1>
    %147 = arith.select %146, %142, %138 : vector<8x128xi1>, vector<8x128xf32>
    %148 = vector.extract_strided_slice %96 {offsets = [40, 0], sizes = [8, 128], strides = [1, 1]} : vector<64x128xf32> to vector<8x128xf32>
    %cst_52 = arith.constant dense<0.000000e+00> : vector<8x128xf32>
    %149 = tpu.matmul %142, %97, %cst_52 {dimension_numbers = #tpu.dot_dimension_numbers<[1], [0], [0], [1], [0, 0, 1, 1], [], []>} : vector<8x128xf32>, vector<128x128xf32>, vector<8x128xf32> -> vector<8x128xf32>
    %150 = arith.addf %148, %149 : vector<8x128xf32>
    %151 = math.tanh %150 : vector<8x128xf32>
    %c5_i32_53 = arith.constant 5 : i32
    %152 = vector.broadcast %c5_i32_53 : i32 to vector<8x1xi32>
    %153 = arith.cmpi eq, %100, %152 : vector<8x1xi32>
    %154 = vector.shape_cast %153 : vector<8x1xi1> to vector<8x1xi1>
    %155 = vector.broadcast %154 : vector<8x1xi1> to vector<8x128xi1>
    %156 = arith.select %155, %151, %147 : vector<8x128xi1>, vector<8x128xf32>
    %157 = vector.extract_strided_slice %96 {offsets = [48, 0], sizes = [8, 128], strides = [1, 1]} : vector<64x128xf32> to vector<8x128xf32>
    %cst_54 = arith.constant dense<0.000000e+00> : vector<8x128xf32>
    %158 = tpu.matmul %151, %97, %cst_54 {dimension_numbers = #tpu.dot_dimension_numbers<[1], [0], [0], [1], [0, 0, 1, 1], [], []>} : vector<8x128xf32>, vector<128x128xf32>, vector<8x128xf32> -> vector<8x128xf32>
    %159 = arith.addf %157, %158 : vector<8x128xf32>
    %160 = math.tanh %159 : vector<8x128xf32>
    %c6_i32_55 = arith.constant 6 : i32
    %161 = vector.broadcast %c6_i32_55 : i32 to vector<8x1xi32>
    %162 = arith.cmpi eq, %100, %161 : vector<8x1xi32>
    %163 = vector.shape_cast %162 : vector<8x1xi1> to vector<8x1xi1>
    %164 = vector.broadcast %163 : vector<8x1xi1> to vector<8x128xi1>
    %165 = arith.select %164, %160, %156 : vector<8x128xi1>, vector<8x128xf32>
    %166 = vector.extract_strided_slice %96 {offsets = [56, 0], sizes = [8, 128], strides = [1, 1]} : vector<64x128xf32> to vector<8x128xf32>
    %cst_56 = arith.constant dense<0.000000e+00> : vector<8x128xf32>
    %167 = tpu.matmul %160, %97, %cst_56 {dimension_numbers = #tpu.dot_dimension_numbers<[1], [0], [0], [1], [0, 0, 1, 1], [], []>} : vector<8x128xf32>, vector<128x128xf32>, vector<8x128xf32> -> vector<8x128xf32>
    %168 = arith.addf %166, %167 : vector<8x128xf32>
    %169 = math.tanh %168 : vector<8x128xf32>
    %c7_i32_57 = arith.constant 7 : i32
    %170 = vector.broadcast %c7_i32_57 : i32 to vector<8x1xi32>
    %171 = arith.cmpi eq, %100, %170 : vector<8x1xi32>
    %172 = vector.shape_cast %171 : vector<8x1xi1> to vector<8x1xi1>
    %173 = vector.broadcast %172 : vector<8x1xi1> to vector<8x128xi1>
    %174 = arith.select %173, %169, %165 : vector<8x128xi1>, vector<8x128xf32>
    %c0_58 = arith.constant 0 : index
    %c0_59 = arith.constant 0 : index
    %c0_60 = arith.constant 0 : index
    %175 = vector.load %arg5[%c0_58, %c0_59, %c0_60] : memref<8x8x128xf32, #tpu.memory_space<vmem>>, vector<8x8x128xf32>
    %cst_61 = arith.constant dense<0xFF800000> : vector<8x128xf32>
    %176 = vector.multi_reduction <maximumf>, %175, %cst_61 [1] : vector<8x8x128xf32> to vector<8x128xf32>
    %c0_62 = arith.constant 0 : index
    %c0_63 = arith.constant 0 : index
    %177 = vector.load %arg13[%c0_62, %c0_63] : memref<128x128xf32, #tpu.memory_space<vmem>>, vector<128x128xf32>
    %cst_64 = arith.constant dense<0.000000e+00> : vector<8x128xf32>
    %178 = tpu.matmul %89, %177, %cst_64 {dimension_numbers = #tpu.dot_dimension_numbers<[1], [0], [0], [1], [0, 0, 1, 1], [], []>} : vector<8x128xf32>, vector<128x128xf32>, vector<8x128xf32> -> vector<8x128xf32>
    %c0_65 = arith.constant 0 : index
    %c0_66 = arith.constant 0 : index
    %179 = vector.load %arg14[%c0_65, %c0_66] : memref<128x128xf32, #tpu.memory_space<vmem>>, vector<128x128xf32>
    %cst_67 = arith.constant dense<0.000000e+00> : vector<8x128xf32>
    %180 = tpu.matmul %174, %179, %cst_67 {dimension_numbers = #tpu.dot_dimension_numbers<[1], [0], [0], [1], [0, 0, 1, 1], [], []>} : vector<8x128xf32>, vector<128x128xf32>, vector<8x128xf32> -> vector<8x128xf32>
    %181 = arith.addf %178, %180 : vector<8x128xf32>
    %c0_68 = arith.constant 0 : index
    %c0_69 = arith.constant 0 : index
    %182 = vector.load %arg15[%c0_68, %c0_69] : memref<128x128xf32, #tpu.memory_space<vmem>>, vector<128x128xf32>
    %cst_70 = arith.constant dense<0.000000e+00> : vector<8x128xf32>
    %183 = tpu.matmul %176, %182, %cst_70 {dimension_numbers = #tpu.dot_dimension_numbers<[1], [0], [0], [1], [0, 0, 1, 1], [], []>} : vector<8x128xf32>, vector<128x128xf32>, vector<8x128xf32> -> vector<8x128xf32>
    %184 = arith.addf %181, %183 : vector<8x128xf32>
    %c0_71 = arith.constant 0 : index
    %c0_72 = arith.constant 0 : index
    %185 = vector.load %arg16[%c0_71, %c0_72] : memref<1x128xf32, #tpu.memory_space<vmem>>, vector<1x128xf32>
    %186 = vector.broadcast %185 : vector<1x128xf32> to vector<8x128xf32>
    %187 = arith.addf %184, %186 : vector<8x128xf32>
    %cst_73 = arith.constant 0.000000e+00 : f32
    %188 = vector.broadcast %cst_73 : f32 to vector<8x128xf32>
    %189 = arith.maximumf %187, %188 : vector<8x128xf32>
    %c0_74 = arith.constant 0 : index
    %c0_75 = arith.constant 0 : index
    %190 = vector.load %arg17[%c0_74, %c0_75] : memref<128x128xf32, #tpu.memory_space<vmem>>, vector<128x128xf32>
    %cst_76 = arith.constant dense<0.000000e+00> : vector<8x128xf32>
    %191 = tpu.matmul %189, %190, %cst_76 {dimension_numbers = #tpu.dot_dimension_numbers<[1], [0], [0], [1], [0, 0, 1, 1], [], []>} : vector<8x128xf32>, vector<128x128xf32>, vector<8x128xf32> -> vector<8x128xf32>
    %c0_77 = arith.constant 0 : index
    %c0_78 = arith.constant 0 : index
    %192 = vector.load %arg18[%c0_77, %c0_78] : memref<1x128xf32, #tpu.memory_space<vmem>>, vector<1x128xf32>
    %193 = vector.broadcast %192 : vector<1x128xf32> to vector<8x128xf32>
    %194 = arith.addf %191, %193 : vector<8x128xf32>
    %cst_79 = arith.constant 0.000000e+00 : f32
    %195 = vector.broadcast %cst_79 : f32 to vector<8x128xf32>
    %196 = arith.maximumf %194, %195 : vector<8x128xf32>
    %c0_80 = arith.constant 0 : index
    %c0_81 = arith.constant 0 : index
    %197 = vector.load %arg19[%c0_80, %c0_81] : memref<128x1xf32, #tpu.memory_space<vmem>>, vector<128x1xf32>
    %cst_82 = arith.constant dense<0.000000e+00> : vector<8x1xf32>
    %198 = tpu.matmul %196, %197, %cst_82 {dimension_numbers = #tpu.dot_dimension_numbers<[1], [0], [0], [1], [0, 0, 1, 1], [], []>} : vector<8x128xf32>, vector<128x1xf32>, vector<8x1xf32> -> vector<8x1xf32>
    %c0_83 = arith.constant 0 : index
    %c0_84 = arith.constant 0 : index
    %199 = vector.load %arg20[%c0_83, %c0_84] : memref<1x1xf32, #tpu.memory_space<vmem>>, vector<1x1xf32>
    %200 = vector.broadcast %199 : vector<1x1xf32> to vector<8x1xf32>
    %201 = arith.addf %198, %200 : vector<8x1xf32>
    %202 = arith.negf %201 : vector<8x1xf32>
    %203 = math.exp %202 : vector<8x1xf32>
    %cst_85 = arith.constant 1.000000e+00 : f32
    %204 = vector.broadcast %cst_85 : f32 to vector<8x1xf32>
    %205 = arith.addf %204, %203 : vector<8x1xf32>
    %206 = arith.divf %204, %205 : vector<8x1xf32>
    %c0_86 = arith.constant 0 : index
    %c0_87 = arith.constant 0 : index
    %207 = vector.load %arg21[%c0_86, %c0_87] : memref<8x1xf32, #tpu.memory_space<vmem>>, vector<8x1xf32>
    tpu.vector_store %arg21[%c0_86, %c0_87], %206 {strides = array<i32>} : memref<8x1xf32, #tpu.memory_space<vmem>>, vector<8x1xf32>,
    return
  }
}

</mosaic_0001>

<bundles_post_ra>
// kernel: model_forward.1
= control target key start
LH: loop header
LB: loop body
LE: loop exit
PB: predicated region body
PF: predicated region fallthrough
CT: control target
= control target key end

     0   :  { %v4279_v3 = vmov 0.0|0.0   ;;  %vm4280_vm0 = vmmov 0   ;;  %v4281_v4 = vmov 0.0   ;;  %v4282_v7 = vmov 0   ;;  %s5479_s7 = inlined_call_operand.vmem [shape: f32[128,128], index: 7, kind: input, shape index: {}]   ;;  %s5480_s3 = inlined_call_operand.vmem [shape: f32[8,8,128], index: 3, kind: input, shape index: {}]   ;;  %s5481_s8 = inlined_call_operand.vmem [shape: f32[128,128], index: 8, kind: input, shape index: {}]   ;;  %s5482_s1 = inlined_call_operand.vmem [shape: s32[8,1], index: 1, kind: input, shape index: {}]   ;;  %s5483_s6 = inlined_call_operand.vmem [shape: f32[128,128], index: 6, kind: input, shape index: {}]   ;;  %s5484_s0 = inlined_call_operand.vmem [shape: s32[8,1], index: 0, kind: input, shape index: {}]   ;;  %s5485_s2 = inlined_call_operand.vmem [shape: f32[8,8,128], index: 2, kind: input, shape index: {}]   ;;  %s5486_s9 = inlined_call_operand.vmem [shape: f32[1,128], index: 9, kind: input, shape index: {}]   ;;  %s5487_s10 = inlined_call_operand.vmem [shape: f32[128,128], index: 10, kind: input, shape index: {}]   ;;  %s5488_s11 = inlined_call_operand.vmem [shape: f32[128,128], index: 11, kind: input, shape index: {}]   ;;  %s5489_s4 = inlined_call_operand.vmem [shape: f32[8,8,128], index: 4, kind: input, shape index: {}]   ;;  %s5490_s12 = inlined_call_operand.vmem [shape: f32[1,128], index: 12, kind: input, shape index: {}]   ;;  %s5491_s14 = inlined_call_operand.vmem [shape: f32[128,128], index: 14, kind: input, shape index: {}]   ;;  %s5492_s13 = inlined_call_operand.vmem [shape: f32[128,128], index: 13, kind: input, shape index: {}]   ;;  %s5493_s5 = inlined_call_operand.vmem [shape: f32[8,8,128], index: 5, kind: input, shape index: {}]   ;;  %s5494_s15 = inlined_call_operand.vmem [shape: f32[128,128], index: 15, kind: input, shape index: {}]   ;;  %s5495_s17 = inlined_call_operand.vmem [shape: f32[128,128], index: 17, kind: input, shape index: {}]   ;;  %s5496_s19 = inlined_call_operand.vmem [shape: f32[128,1], index: 19, kind: input, shape index: {}]   ;;  %s5497_s16 = inlined_call_operand.vmem [shape: f32[1,128], index: 16, kind: input, shape index: {}]   ;;  %s5498_s20 = inlined_call_operand.<no memory space> [shape: f32[1,1], index: 20, kind: input, shape index: {}]   ;;  %s5499_s18 = inlined_call_operand.vmem [shape: f32[1,128], index: 18, kind: input, shape index: {}]   ;;  %s5500_s21 = inlined_call_operand.vmem [shape: f32[8,1], index: 21, kind: output, shape index: {}]  }
   0x1   :  { %5505 = sst [smem:[#allocation3_spill]] %s5479_s7  ;;  %3693 = vmatprep.subr.bf16.mxu1 %v4279_v3  ;;  %2882 = vmatprep.mubr.msk.f32.mxu1 %vm4280_vm0, %v4281_v4 }
   0x2   :  { %5506 = sst [smem:[#allocation4_spill]] %s5480_s3  ;;  %s5511_s26 = sld [smem:[#allocation3_spill]]  ;;  %4241 = vset.pattern.permute.xlu0 %v4282_v7  ;;  %4242 = vset.pattern.permute.xlu1 %v4282_v7 }
   0x3   :  { %5507 = sst [smem:[#allocation5_spill]] %s5481_s8  ;;  %s5512_s8 = sld [smem:[#allocation4_spill]] }
   0x4   :  { %5508 = sst [smem:[#allocation6_spill]] %s5482_s1  ;;  %s5513_s7 = sld [smem:[#allocation5_spill]] }
   0x5   :  { %5509 = sst [smem:[#allocation7_spill]] %s5483_s6  ;;  %s5514_s1 = sld [smem:[#allocation6_spill]] }
   0x6   :  { %5510 = sst [smem:[#allocation8_spill]] %s5484_s0  ;;  %s5515_s25 = sld [smem:[#allocation7_spill]] }
   0x7   :  { %s5516_s23 = sld [smem:[#allocation8_spill]] }
   0x8   :  { %v102_v0 = vld [vmem:[%s5511_s26] sm:$0xff]  ;;  %v103_v1 = vld [vmem:[%s5511_s26 + $0x8] sm:$0xff]  ;;  %v104_v2 = vld [vmem:[%s5511_s26 + $0x10] sm:$0xff] }
   0x9   :  { %v3629_v5 = vpack.c.bf16 %v103_v1, %v102_v0  ;;  %v105_v6 = vld [vmem:[%s5511_s26 + $0x18] sm:$0xff]  ;;  %v106_v9 = vld [vmem:[%s5511_s26 + $0x20] sm:$0xff]  ;;  %v107_v10 = vld [vmem:[%s5511_s26 + $0x28] sm:$0xff] }
   0xa   :  { %v3633_v8 = vpack.c.bf16 %v105_v6, %v104_v2  ;;  %v3637_v11 = vpack.c.bf16 %v107_v10, %v106_v9  ;;  %v78_v12 = vld [vmem:[%s5512_s8] sm:$0xff]  ;;  %v108_v13 = vld [vmem:[%s5511_s26 + $0x30] sm:$0xff]  ;;  %v109_v14 = vld [vmem:[%s5511_s26 + $0x38] sm:$0xff] }
   0xb   :  { %3630 = vmatprep.subr.bf16.mxu0 %v3629_v5  ;;  %2794 = vmatprep.mubr.f32.mxu0 %v78_v12  ;;  %v343_v15 = vld [vmem:[%s5513_s7] sm:$0xff]  ;;  %v344_v16 = vld [vmem:[%s5513_s7 + $0x8] sm:$0xff]  ;;  %v345_v18 = vld [vmem:[%s5513_s7 + $0x10] sm:$0xff]  ;;  %v3641_v20 = vpack.c.bf16 %v109_v14, %v108_v13 }
   0xc   :  { %3632 = vmatpush3.bf16.msra.mxu0 %v3629_v5  ;;  %v4431_v17 = vpack.c.bf16 %v344_v16, %v343_v15  ;;  %v346_v19 = vld [vmem:[%s5513_s7 + $0x18] sm:$0xff]  ;;  %v110_v21 = vld [vmem:[%s5511_s26 + $0x40] sm:$0xff]  ;;  %v111_v22 = vld [vmem:[%s5511_s26 + $0x48] sm:$0xff] }
   0xd   :  { %3634 = vmatprep.subr.bf16.mxu0 %v3633_v8  ;;  %v4446_v23 = vpack.c.bf16 %v346_v19, %v345_v18  ;;  %v347_v24 = vld [vmem:[%s5513_s7 + $0x20] sm:$0xff]  ;;  %v348_v25 = vld [vmem:[%s5513_s7 + $0x28] sm:$0xff]  ;;  %v3645_v26 = vpack.c.bf16 %v111_v22, %v110_v21  ;;  %v112_v27 = vld [vmem:[%s5511_s26 + $0x50] sm:$0xff] }
   0xe   :  { %3695 = vmatpush3.bf16.msra.mxu1 %v4431_v17  ;;  %v113_v28 = vld [vmem:[%s5511_s26 + $0x58] sm:$0xff]  ;;  %v4462_v29 = vpack.c.bf16 %v348_v25, %v347_v24  ;;  %v349_v30 = vld [vmem:[%s5513_s7 + $0x30] sm:$0xff]  ;;  %v114_v33 = vld [vmem:[%s5511_s26 + $0x60] sm:$0xff] }
   0xf   :  { %3696 = vmatprep.subr.bf16.mxu1 %v4279_v3  ;;  %v350_v31 = vld [vmem:[%s5513_s7 + $0x38] sm:$0xff]  ;;  %v3649_v32 = vpack.c.bf16 %v113_v28, %v112_v27  ;;  %v115_v34 = vld [vmem:[%s5511_s26 + $0x68] sm:$0xff]  ;;  %v351_v36 = vld [vmem:[%s5513_s7 + $0x40] sm:$0xff] }
  0x10   :  { %3636 = vmatpush3.bf16.msra.mxu0 %v3633_v8  ;;  %v4478_v35 = vpack.c.bf16 %v350_v31, %v349_v30  ;;  %v352_v37 = vld [vmem:[%s5513_s7 + $0x48] sm:$0xff]  ;;  %v3653_v38 = vpack.c.bf16 %v115_v34, %v114_v33  ;;  %v1145_v39 = vld [vmem:[%s5514_s1] sm:$0xff]  ;;  %v116_v40 = vld [vmem:[%s5511_s26 + $0x70] sm:$0xff] }
  0x11   :  { %3638 = vmatprep.subr.bf16.mxu0 %v3637_v11  ;;  %v117_v41 = vld [vmem:[%s5511_s26 + $0x78] sm:$0xff]  ;;  %v4497_v42 = vpack.c.bf16 %v352_v37, %v351_v36  ;;  %v4499_v43 = vadd.s32 4294967295, %v1145_v39  ;;  %v353_v44 = vld [vmem:[%s5513_s7 + $0x50] sm:$0xff]  ;;  %v86_v48 = vld [vmem:[%s5515_s25] sm:$0xff] }
  0x12   :  { %3698 = vmatpush3.bf16.msra.mxu1 %v4446_v23  ;;  %v354_v45 = vld [vmem:[%s5513_s7 + $0x58] sm:$0xff]  ;;  %v3657_v46 = vpack.c.bf16 %v117_v41, %v116_v40  ;;  %v87_v49 = vld [vmem:[%s5515_s25 + $0x8] sm:$0xff]  ;;  %v355_v51 = vld [vmem:[%s5513_s7 + $0x60] sm:$0xff] }
  0x13   :  { %3699 = vmatprep.subr.bf16.mxu1 %v4279_v3  ;;  %vm1219_vm1 = vcmp.eq.s32.totalorder %v4499_v43, 0  ;;  %vm1298_vm2 = vcmp.eq.s32.totalorder %v4499_v43, 1  ;;  %v4518_v50 = vpack.c.bf16 %v354_v45, %v353_v44  ;;  %v356_v52 = vld [vmem:[%s5513_s7 + $0x68] sm:$0xff]  ;;  %vm1535_vm3 = vcmp.eq.s32.totalorder %v4499_v43, 4  ;;  %v359_v55 = vld [vmem:[%s5516_s23] sm:$0xff]  ;;  %v88_v56 = vld [vmem:[%s5515_s25 + $0x10] sm:$0xff] }
  0x14   :  { %3640 = vmatpush3.bf16.msra.mxu0 %v3637_v11  ;;  %v1220_v47 = vsel %vm1219_vm1, 1, %v4282_v7  ;;  %v1299_v53 = vsel %vm1298_vm2, 1, %v4282_v7  ;;  %v3661_v54 = vpack.c.bf16 %v87_v49, %v86_v48  ;;  %v89_v57 = vld [vmem:[%s5515_s25 + $0x18] sm:$0xff]  ;;  %v4539_v58 = vpack.c.bf16 %v356_v52, %v355_v51  ;;  %v357_v59 = vld [vmem:[%s5513_s7 + $0x70] sm:$0xff]  ;;  %v79_v62 = vld [vmem:[%s5512_s8 + $0x8] sm:$0xff] }
  0x15   :  { %3642 = vmatprep.subr.bf16.mxu0 %v3641_v20  ;;  %1222 = vperm.xlu0 %4241, %v1220_v47   ;;  %v358_v60 = vld [vmem:[%s5513_s7 + $0x78] sm:$0xff]  ;;  %v1536_v61 = vsel %vm1535_vm3, 1, %v4282_v7  ;;  %vm1693_vm4 = vcmp.eq.s32.totalorder %v4499_v43, 6  ;;  %v4553_v63 = vadd.s32 4294967295, %v359_v55  ;;  %v3665_v0 = vpack.c.bf16 %v89_v57, %v88_v56  ;;  %v80_v1 = vld [vmem:[%s5512_s8 + $0x10] sm:$0xff]  ;;  %v90_v2 = vld [vmem:[%s5515_s25 + $0x20] sm:$0xff] }
  0x16   :  { %3701 = vmatpush3.bf16.msra.mxu1 %v4462_v29  ;;  %v91_v5 = vld [vmem:[%s5515_s25 + $0x28] sm:$0xff]  ;;  %v4565_v6 = vpack.c.bf16 %v358_v60, %v357_v59  ;;  %v1694_v8 = vsel %vm1693_vm4, 1, %v4282_v7  ;;  %v81_v9 = vld [vmem:[%s5512_s8 + $0x18] sm:$0xff]  ;;  %v82_v11 = vld [vmem:[%s5512_s8 + $0x20] sm:$0xff]  ;;  %vm1377_vm6 = vcmp.eq.s32.totalorder %v4499_v43, 2  ;;  %vm1456_vm7 = vcmp.eq.s32.totalorder %v4499_v43, 3 }
  0x17   :  { %3702 = vmatprep.subr.bf16.mxu1 %v4279_v3  ;;  %vm433_vm5 = vcmp.eq.s32.totalorder %v4553_v63, 0  ;;  %v3669_v10 = vpack.c.bf16 %v91_v5, %v90_v2  ;;  %v92_v12 = vld [vmem:[%s5515_s25 + $0x30] sm:$0xff]  ;;  %v93_v13 = vld [vmem:[%s5515_s25 + $0x38] sm:$0xff]  ;;  %v83_v15 = vld [vmem:[%s5512_s8 + $0x28] sm:$0xff]  ;;  %v1378_v45 = vsel %vm1377_vm6, 1, %v4282_v7  ;;  %vm1614_vm8 = vcmp.eq.s32.totalorder %v4499_v43, 5 }
  0x18   :  { %3644 = vmatpush3.bf16.msra.mxu0 %v3641_v20  ;;  %v434_v14 = vsel %vm433_vm5, 1, %v4282_v7  ;;  %v3673_v16 = vpack.c.bf16 %v93_v13, %v92_v12  ;;  %v84_v18 = vld [vmem:[%s5512_s8 + $0x30] sm:$0xff]  ;;  %v94_v19 = vld [vmem:[%s5515_s25 + $0x40] sm:$0xff]  ;;  %v95_v20 = vld [vmem:[%s5515_s25 + $0x48] sm:$0xff]  ;;  %1380 = vperm.xlu1 %4242, %v1378_v45   ;;  %v1615_v47 = vsel %vm1614_vm8, 1, %v4282_v7  ;;  %vm1772_vm9 = vcmp.eq.s32.totalorder %v4499_v43, 7 }
  0x19   :  { %3646 = vmatprep.subr.bf16.mxu0 %v3645_v26  ;;  %1301 = vperm.xlu0 %4241, %v1299_v53   ;;  %v85_v21 = vld [vmem:[%s5512_s8 + $0x38] sm:$0xff]  ;;  %v3677_v22 = vpack.c.bf16 %v95_v20, %v94_v19  ;;  %v70_v24 = vld [vmem:[%s5485_s2] sm:$0xff]  ;;  %v96_v25 = vld [vmem:[%s5515_s25 + $0x50] sm:$0xff]  ;;  %v1773_v48 = vsel %vm1772_vm9, 1, %v4282_v7  ;;  %vm512_vm10 = vcmp.eq.s32.totalorder %v4553_v63, 1  ;;  %vm591_vm11 = vcmp.eq.s32.totalorder %v4553_v63, 2 }
  0x1a   :  { %3704 = vmatpush3.bf16.msra.mxu1 %v4478_v35  ;;  %v98_v28 = vld [vmem:[%s5515_s25 + $0x60] sm:$0xff]  ;;  %v99_v30 = vld [vmem:[%s5515_s25 + $0x68] sm:$0xff]  ;;  %v101_v33 = vld [vmem:[%s5515_s25 + $0x78] sm:$0xff]  ;;  %v513_v49 = vsel %vm512_vm10, 1, %v4282_v7  ;;  %v592_v13 = vsel %vm591_vm11, 1, %v4282_v7  ;;  %vm670_vm14 = vcmp.eq.s32.totalorder %v4553_v63, 3 }
  0x1b   :  { %3705 = vmatprep.subr.bf16.mxu1 %v4279_v3  ;;  %v3685_v31 = vpack.c.bf16 %v99_v30, %v98_v28  ;;  %v71_v36 = vld [vmem:[%s5485_s2 + $0x8] sm:$0xff]  ;;  %v72_v37 = vld [vmem:[%s5485_s2 + $0x10] sm:$0xff]  ;;  %v74_v39 = vld [vmem:[%s5485_s2 + $0x20] sm:$0xff]  ;;  %vm749_vm1 = vcmp.eq.s32.totalorder %v4553_v63, 4  ;;  %vm828_vm3 = vcmp.eq.s32.totalorder %v4553_v63, 5  ;;  %vm907_vm5 = vcmp.eq.s32.totalorder %v4553_v63, 6 }
  0x1c   :  { %3648 = vmatpush3.bf16.msra.mxu0 %v3645_v26  ;;  %v97_v26 = vld [vmem:[%s5515_s25 + $0x58] sm:$0xff]  ;;  %v75_v40 = vld [vmem:[%s5485_s2 + $0x28] sm:$0xff]  ;;  %v76_v41 = vld [vmem:[%s5485_s2 + $0x30] sm:$0xff] }
  0x1d   :  { %3650 = vmatprep.subr.bf16.mxu0 %v3649_v32  ;;  %1538 = vperm.xlu0 %4241, %v1536_v61   ;;  %v3681_v27 = vpack.c.bf16 %v97_v26, %v96_v25  ;;  %v77_v44 = vld [vmem:[%s5485_s2 + $0x38] sm:$0xff]  ;;  %v2325_v53 = vld [vmem:[%s5486_s9] ss:$0 sm:$0xff] }
  0x1e   :  { %3707 = vmatpush3.bf16.msra.mxu1 %v4497_v42 }
  0x1f   :  { %3708 = vmatprep.subr.bf16.mxu1 %v4279_v3 }
  0x20   :  { %3652 = vmatpush3.bf16.msra.mxu0 %v3649_v32  ;;  %v100_v32 = vld [vmem:[%s5515_s25 + $0x70] sm:$0xff] }
  0x21   :  { %3654 = vmatprep.subr.bf16.mxu0 %v3653_v38  ;;  %1696 = vperm.xlu0 %4241, %v1694_v8   ;;  %v3689_v34 = vpack.c.bf16 %v101_v33, %v100_v32  ;;  %v671_v33 = vsel %vm670_vm14, 1, %v4282_v7 }
  0x22   :  { %3710 = vmatpush3.bf16.msra.mxu1 %v4518_v50 }
  0x23   :  { %3711 = vmatprep.subr.bf16.mxu1 %v4279_v3 }
  0x24   :  { %3656 = vmatpush3.bf16.msra.mxu0 %v3653_v38  ;;  %v73_v38 = vld [vmem:[%s5485_s2 + $0x18] sm:$0xff] }
  0x25   :  { %3658 = vmatprep.subr.bf16.mxu0 %v3657_v46  ;;  %436 = vperm.xlu0 %4241, %v434_v14  }
  0x26   :  { %3713 = vmatpush3.bf16.msra.mxu1 %v4539_v58 }
  0x27   :  { %3714 = vmatprep.subr.bf16.mxu1 %v4279_v3 }
  0x28   :  { %3660 = vmatpush3.bf16.msra.mxu0 %v3657_v46  ;;  %v1457_v46 = vsel %vm1456_vm7, 1, %v4282_v7  ;;  %vm986_vm7 = vcmp.eq.s32.totalorder %v4553_v63, 7  ;;  %v1137_v63 = vld [vmem:[%s5488_s11 + $0x40] sm:$0xff] }
  0x29   :  { %3662 = vmatprep.subr.bf16.mxu0 %v3661_v54  ;;  %1459 = vperm.xlu1 %4242, %v1457_v46  }
  0x2a   :  { %3716 = vmatpush3.bf16.msra.mxu1 %v4565_v6  ;;  %594 = vperm.xlu0 %4241, %v592_v13   ;;  %v1010_v13 = vld [vmem:[%s5487_s10 + $0x48] sm:$0xff] }
  0x2b   :  { %2795 = vmatmul.mubr.f32.vlgmr.msra.gmra.mrb[0].mxu0 %v79_v62  ;;  %3717 = vmatprep.subr.bf16.mxu1 %v4279_v3 }
  0x2c   :  { %3664 = vmatpush3.bf16.msra.mxu0 %v3661_v54  ;;  %2797 = vmatprep.mubr.f32.mxu0 %v80_v1 }
  0x2d   :  { %3666 = vmatprep.subr.bf16.mxu0 %v3665_v0  ;;  %2883 = vmatmul.mubr.f32.vlgmr.msra.gmra.mrb[0].mxu1 %v4281_v4 }
  0x2e   :  { %3719 = vmatpush3.bf16.msra.mxu1 %v4431_v17  ;;  %2917 = vmatprep.mubr.msk.f32.mxu1 %vm4280_vm0, %v4281_v4 }
  0x2f   :  { %2798 = vmatmul.mubr.f32.gmra.mrb[2].mxu0 %v81_v9  ;;  %3720 = vmatprep.subr.bf16.mxu1 %v4279_v3 }
  0x30   :  { %3668 = vmatpush3.bf16.msra.mxu0 %v3665_v0  ;;  %2800 = vmatprep.mubr.f32.mxu0 %v82_v11 }
  0x31   :  { %3670 = vmatprep.subr.bf16.mxu0 %v3669_v10  ;;  %1617 = vperm.xlu1 %4242, %v1615_v47  }
  0x32   :  { %3722 = vmatpush3.bf16.msra.mxu1 %v4446_v23 }
  0x33   :  { %2801 = vmatmul.mubr.f32.gmra.mrb[4].mxu0 %v83_v15  ;;  %3723 = vmatprep.subr.bf16.mxu1 %v4279_v3 }
  0x34   :  { %3672 = vmatpush3.bf16.msra.mxu0 %v3669_v10  ;;  %2803 = vmatprep.mubr.f32.mxu0 %v84_v18 }
  0x35   :  { %3674 = vmatprep.subr.bf16.mxu0 %v3673_v16  ;;  %1775 = vperm.xlu1 %4242, %v1773_v48  }
  0x36   :  { %3725 = vmatpush3.bf16.msra.mxu1 %v4462_v29 }
  0x37   :  { %2804 = vmatmul.mubr.f32.gmra.mrb[6].mxu0 %v85_v21  ;;  %3726 = vmatprep.subr.bf16.mxu1 %v4279_v3 }
  0x38   :  { %3676 = vmatpush3.bf16.msra.mxu0 %v3673_v16  ;;  %2838 = vmatprep.mubr.f32.mxu0 %v70_v24 }
  0x39   :  { %3678 = vmatprep.subr.bf16.mxu0 %v3677_v22  ;;  %515 = vperm.xlu1 %4242, %v513_v49  }
  0x3a   :  { %3728 = vmatpush3.bf16.msra.mxu1 %v4478_v35 }
  0x3b   :  { %3729 = vmatprep.subr.bf16.mxu1 %v4279_v3 }
  0x3c   :  { %3680 = vmatpush3.bf16.msra.mxu0 %v3677_v22 }
  0x3d   :  { %3682 = vmatprep.subr.bf16.mxu0 %v3681_v27  ;;  %673 = vperm.xlu1 %4242, %v671_v33   ;;  %v1016_v33 = vld [vmem:[%s5487_s10 + $0x78] sm:$0xff] }
  0x3e   :  { %3731 = vmatpush3.bf16.msra.mxu1 %v4497_v42 }
  0x3f   :  { %3732 = vmatprep.subr.bf16.mxu1 %v4279_v3 }
  0x40   :  { %3684 = vmatpush3.bf16.msra.mxu0 %v3681_v27 }
  0x41   :  { %3686 = vmatprep.subr.bf16.mxu0 %v3685_v31 }
  0x42   :  { %3734 = vmatpush3.bf16.msra.mxu1 %v4518_v50 }
  0x43   :  { %3735 = vmatprep.subr.bf16.mxu1 %v4279_v3 }
  0x44   :  { %3688 = vmatpush3.bf16.msra.mxu0 %v3685_v31 }
  0x45   :  { %3690 = vmatprep.subr.bf16.mxu0 %v3689_v34 }
  0x46   :  { %3737 = vmatpush3.bf16.msra.mxu1 %v4539_v58 }
  0x47   :  { %3738 = vmatprep.subr.bf16.mxu1 %v4279_v3 }
  0x48   :  { %3692 = vmatpush3.bf16.msra.mxu0 %v3689_v34 }
  0x49   :  { %3741 = vmatprep.subr.bf16.mxu0 %v4279_v3 }
  0x4a   :  { %3740 = vmatpush3.bf16.msra.mxu1 %v4565_v6 }
  0x4b   :  { %2839 = vmatmul.mubr.f32.vlgmr.msra.gmra.mrb[0].mxu0 %v71_v36  ;;  %3765 = vmatprep.subr.bf16.mxu1 %v4279_v3 }
  0x4c   :  { %2841 = vmatprep.mubr.f32.mxu0 %v72_v37  ;;  %3743 = vmatpush3.bf16.msra.mxu0 %v4431_v17 }
  0x4d   :  { %3744 = vmatprep.subr.bf16.mxu0 %v4279_v3 }
  0x4f   :  { %2842 = vmatmul.mubr.f32.gmra.mrb[2].mxu0 %v73_v38 }
  0x50   :  { %2844 = vmatprep.mubr.f32.mxu0 %v74_v39  ;;  %3746 = vmatpush3.bf16.msra.mxu0 %v4446_v23 }
  0x51   :  { %3747 = vmatprep.subr.bf16.mxu0 %v4279_v3 }
  0x53   :  { %2845 = vmatmul.mubr.f32.gmra.mrb[4].mxu0 %v75_v40 }
  0x54   :  { %2847 = vmatprep.mubr.f32.mxu0 %v76_v41  ;;  %3749 = vmatpush3.bf16.msra.mxu0 %v4462_v29  ;;  %v750_v41 = vsel %vm749_vm1, 1, %v4282_v7 }
  0x55   :  { %3750 = vmatprep.subr.bf16.mxu0 %v4279_v3  ;;  %752 = vperm.xlu0 %4241, %v750_v41   ;;  %v1131_v41 = vld [vmem:[%s5488_s11 + $0x10] sm:$0xff] }
  0x57   :  { %2848 = vmatmul.mubr.f32.gmra.mrb[6].mxu0 %v77_v44 }
  0x58   :  { %3752 = vmatpush3.bf16.msra.mxu0 %v4478_v35  ;;  %2952 = vmatprep.mubr.msk.f32.mxu0 %vm4280_vm0, %v4281_v4 }
  0x59   :  { %3753 = vmatprep.subr.bf16.mxu0 %v4279_v3 }
  0x5c   :  { %3755 = vmatpush3.bf16.msra.mxu0 %v4497_v42 }
  0x5d   :  { %3756 = vmatprep.subr.bf16.mxu0 %v4279_v3 }
  0x60   :  { %3758 = vmatpush3.bf16.msra.mxu0 %v4518_v50 }
  0x61   :  { %3759 = vmatprep.subr.bf16.mxu0 %v4279_v3 }
  0x64   :  { %3761 = vmatpush3.bf16.msra.mxu0 %v4539_v58 }
  0x65   :  { %3762 = vmatprep.subr.bf16.mxu0 %v4279_v3 }
  0x68   :  { %3764 = vmatpush3.bf16.msra.mxu0 %v4565_v6 }
  0x69   :  { %3789 = vmatprep.subr.bf16.mxu0 %v4279_v3 }
  0x94   :  { %v4725_v14 = vpop.permute.xlu0 %1222 }
  0x95   :  { %vm1224_vm10 = vcmp.eq.s32.totalorder %v4725_v14, 1 }
  0x97   :  { %v4727_v15 = vpop.permute.xlu1 %1380 }
  0x98   :  { %v4729_v16 = vpop.permute.xlu0 %1301 }
  0x99   :  { %vm1303_vm11 = vcmp.eq.s32.totalorder %v4729_v16, 1 }
  0x9c   :  { %v4733_v19 = vpop.permute.xlu0 %1538 }
  0x9d   :  { %vm1540_vm14 = vcmp.eq.s32.totalorder %v4733_v19, 1 }
  0xa0   :  { %v4737_v22 = vpop.permute.xlu0 %1696 }
  0xa1   :  { %vm1698_vm1 = vcmp.eq.s32.totalorder %v4737_v22, 1  ;;  %v1839_v22 = vld [vmem:[%s5492_s13 + $0x20] sm:$0xff] }
  0xa4   :  { %v437_v27 = vpop.permute.xlu0 %436 }
  0xa5   :  { %vm438_vm12 = vcmp.eq.s32.totalorder %v437_v27, 1 }
  0xa8   :  { %v4731_v18 = vpop.permute.xlu1 %1459 }
  0xa9   :  { %v595_v38 = vpop.permute.xlu0 %594 }
  0xaa   :  { %vm596_vm15 = vcmp.eq.s32.totalorder %v595_v38, 1  ;;  %v993_v38 = vld [vmem:[%s5489_s4] sm:$0xff] }
  0xb0   :  { %v4735_v20 = vpop.permute.xlu1 %1617 }
  0xb4   :  { %v4739_v26 = vpop.permute.xlu1 %1775 }
  0xb8   :  { %v516_v28 = vpop.permute.xlu1 %515 }
  0xb9   :  { %vm517_vm13 = vcmp.eq.s32.totalorder %v516_v28, 1  ;;  %v1013_v28 = vld [vmem:[%s5487_s10 + $0x60] sm:$0xff] }
  0xbc   :  { %v674_v47 = vpop.permute.xlu1 %673 }
  0xbd   :  { %vm675_vm2 = vcmp.eq.s32.totalorder %v674_v47, 1  ;;  %v1134_v47 = vld [vmem:[%s5488_s11 + $0x28] sm:$0xff] }
 0x100   :  { %v427_v51 = vpop.f32.mrb[0].mxu1 }
 0x101   :  { %v2884_v52 = vpop.f32.mrb[1].mxu1 }
 0x11e   :  { %v2840_v54 = vpop.f32.mrb[0].mxu0 }
 0x11f   :  { %v336_v55 = vadd.f32 %v2840_v54, %v2325_v53  ;;  %v289_v56 = vpop.f32.mrb[1].mxu0 }
 0x120   :  { %v335_v57 = vadd.f32 %v2325_v53, %v289_v56 }
 0x122   :  { %v431_v43 = vadd.f32 %v427_v51, %v335_v57  ;;  %v2843_v59 = vpop.f32.mrb[2].mxu0  ;;  %v829_v51 = vsel %vm828_vm3, 1, %v4282_v7  ;;  %vm2031_vm3 = vcmask 1041409  }
 0x123   :  { %v4693_v60 = vadd.f32 %v2843_v59, %v2325_v53  ;;  %v299_v61 = vpop.f32.mrb[3].mxu0  ;;  %831 = vperm.xlu1 %4242, %v829_v51   ;;  %v1135_v51 = vld [vmem:[%s5488_s11 + $0x30] sm:$0xff] }
 0x124   :  { %4243 = vtanh.f32 %v431_v43  ;;  %v4695_v62 = vadd.f32 %v2325_v53, %v299_v61  ;;  %v1002_v43 = vld [vmem:[%s5487_s10 + $0x8] sm:$0xff]  ;;  %v1004_v61 = vld [vmem:[%s5487_s10 + $0x18] sm:$0xff] }
 0x126   :  { %v2846_v0 = vpop.f32.mrb[4].mxu0 }
 0x127   :  { %v4697_v1 = vadd.f32 %v2846_v0, %v2325_v53  ;;  %v309_v2 = vpop.f32.mrb[5].mxu0  ;;  %v1005_v0 = vld [vmem:[%s5487_s10 + $0x20] sm:$0xff] }
 0x128   :  { %v4699_v5 = vadd.f32 %v2325_v53, %v309_v2 }
 0x12a   :  { %v2849_v8 = vpop.f32.mrb[6].mxu0 }
 0x12b   :  { %v4701_v9 = vadd.f32 %v2849_v8, %v2325_v53  ;;  %v319_v10 = vpop.f32.mrb[7].mxu0  ;;  %v1008_v8 = vld [vmem:[%s5487_s10 + $0x38] sm:$0xff] }
 0x12c   :  { %v4703_v11 = vadd.f32 %v2325_v53, %v319_v10 }
 0x12e   :  { %v4244_v12 = vpop.eup %4243 }
 0x12f   :  { %2918 = vmatmul.mubr.f32.vlgmr.msra.gmra.mrb[2].mxu1 %v4244_v12  ;;  %v439_v31 = vsel %vm438_vm12, %v4244_v12, 0.0  ;;  %v1009_v12 = vld [vmem:[%s5487_s10 + $0x40] sm:$0xff]  ;;  %vm1382_vm12 = vcmp.eq.s32.totalorder %v4727_v15, 1 }
 0x130   :  { %3767 = vmatpush3.bf16.msra.mxu1 %v4431_v17  ;;  %2987 = vmatprep.mubr.msk.f32.mxu1 %vm4280_vm0, %v4281_v4 }
 0x131   :  { %3768 = vmatprep.subr.bf16.mxu1 %v4279_v3 }
 0x134   :  { %3770 = vmatpush3.bf16.msra.mxu1 %v4446_v23 }
 0x135   :  { %3771 = vmatprep.subr.bf16.mxu1 %v4279_v3 }
 0x138   :  { %3773 = vmatpush3.bf16.msra.mxu1 %v4462_v29 }
 0x139   :  { %3774 = vmatprep.subr.bf16.mxu1 %v4279_v3 }
 0x13c   :  { %3776 = vmatpush3.bf16.msra.mxu1 %v4478_v35 }
 0x13d   :  { %3777 = vmatprep.subr.bf16.mxu1 %v4279_v3 }
 0x140   :  { %3779 = vmatpush3.bf16.msra.mxu1 %v4497_v42 }
 0x141   :  { %3780 = vmatprep.subr.bf16.mxu1 %v4279_v3 }
 0x144   :  { %3782 = vmatpush3.bf16.msra.mxu1 %v4518_v50 }
 0x145   :  { %3783 = vmatprep.subr.bf16.mxu1 %v4279_v3 }
 0x148   :  { %3785 = vmatpush3.bf16.msra.mxu1 %v4539_v58 }
 0x149   :  { %3786 = vmatprep.subr.bf16.mxu1 %v4279_v3 }
 0x14c   :  { %3788 = vmatpush3.bf16.msra.mxu1 %v4565_v6 }
 0x14d   :  { %3813 = vmatprep.subr.bf16.mxu1 %v4279_v3 }
 0x202   :  { %v506_v21 = vpop.f32.mrb[2].mxu1 }
 0x203   :  { %v510_v24 = vadd.f32 %v506_v21, %v336_v55  ;;  %v2919_v25 = vpop.f32.mrb[3].mxu1  ;;  %v753_v55 = vpop.permute.xlu0 %752  ;;  %v3901_v21 = vpack.c.bf16 %v1010_v13, %v1009_v12 }
 0x204   :  { %vm754_vm4 = vcmp.eq.s32.totalorder %v753_v55, 1  ;;  %v1012_v25 = vld [vmem:[%s5487_s10 + $0x58] sm:$0xff]  ;;  %v1139_v55 = vld [vmem:[%s5488_s11 + $0x50] sm:$0xff] }
 0x205   :  { %4245 = vtanh.f32 %v510_v24  ;;  %v1011_v24 = vld [vmem:[%s5487_s10 + $0x50] sm:$0xff] }
 0x206   :  { %v3905_v27 = vpack.c.bf16 %v1012_v25, %v1011_v24 }
 0x20f   :  { %v4246_v30 = vpop.eup %4245 }
 0x210   :  { %v518_v32 = vsel %vm517_vm13, %v4246_v30, %v439_v31  ;;  %2953 = vmatmul.mubr.f32.vlgmr.msra.gmra.mrb[8].mxu0 %v4246_v30  ;;  %v1014_v30 = vld [vmem:[%s5487_s10 + $0x68] sm:$0xff]  ;;  %vm1461_vm13 = vcmp.eq.s32.totalorder %v4731_v18, 1 }
 0x211   :  { %3791 = vmatpush3.bf16.msra.mxu0 %v4431_v17  ;;  %3022 = vmatprep.mubr.msk.f32.mxu0 %vm4280_vm0, %v4281_v4  ;;  %v3909_v31 = vpack.c.bf16 %v1014_v30, %v1013_v28  ;;  %v5028_v28 = vld [vmem:[%s5490_s12] ss:$0 sm:$0xff] }
 0x212   :  { %3792 = vmatprep.subr.bf16.mxu0 %v4279_v3 }
 0x215   :  { %3794 = vmatpush3.bf16.msra.mxu0 %v4446_v23 }
 0x216   :  { %3795 = vmatprep.subr.bf16.mxu0 %v4279_v3 }
 0x219   :  { %3797 = vmatpush3.bf16.msra.mxu0 %v4462_v29 }
 0x21a   :  { %3798 = vmatprep.subr.bf16.mxu0 %v4279_v3 }
 0x21d   :  { %3800 = vmatpush3.bf16.msra.mxu0 %v4478_v35 }
 0x21e   :  { %3801 = vmatprep.subr.bf16.mxu0 %v4279_v3 }
 0x221   :  { %3803 = vmatpush3.bf16.msra.mxu0 %v4497_v42 }
 0x222   :  { %3804 = vmatprep.subr.bf16.mxu0 %v4279_v3 }
 0x225   :  { %3806 = vmatpush3.bf16.msra.mxu0 %v4518_v50 }
 0x226   :  { %3807 = vmatprep.subr.bf16.mxu0 %v4279_v3 }
 0x229   :  { %3809 = vmatpush3.bf16.msra.mxu0 %v4539_v58 }
 0x22a   :  { %3810 = vmatprep.subr.bf16.mxu0 %v4279_v3 }
 0x22d   :  { %3812 = vmatpush3.bf16.msra.mxu0 %v4565_v6 }
 0x22e   :  { %3837 = vmatprep.subr.bf16.mxu0 %v4279_v3 }
 0x2e3   :  { %v585_v34 = vpop.f32.mrb[8].mxu0 }
 0x2e4   :  { %v589_v36 = vadd.f32 %v585_v34, %v4695_v62  ;;  %v2954_v37 = vpop.f32.mrb[9].mxu0 }
 0x2e5   :  { %v1130_v37 = vld [vmem:[%s5488_s11 + $0x8] sm:$0xff] }
 0x2e6   :  { %4247 = vtanh.f32 %v589_v36  ;;  %v1129_v36 = vld [vmem:[%s5488_s11] sm:$0xff] }
 0x2f0   :  { %v4248_v39 = vpop.eup %4247 }
 0x2f1   :  { %v597_v40 = vsel %vm596_vm15, %v4248_v39, %v518_v32  ;;  %2988 = vmatmul.mubr.f32.vlgmr.msra.gmra.mrb[4].mxu1 %v4248_v39  ;;  %v1015_v32 = vld [vmem:[%s5487_s10 + $0x70] sm:$0xff]  ;;  %v994_v39 = vld [vmem:[%s5489_s4 + $0x8] sm:$0xff]  ;;  %vm1619_vm15 = vcmp.eq.s32.totalorder %v4735_v20, 1  ;;  %v1854_v20 = vld [vmem:[%s5491_s14 + $0x18] sm:$0xff] }
 0x2f2   :  { %3815 = vmatpush3.bf16.msra.mxu1 %v4431_v17  ;;  %3057 = vmatprep.mubr.msk.f32.mxu1 %vm4280_vm0, %v4281_v4  ;;  %v3913_v34 = vpack.c.bf16 %v1016_v33, %v1015_v32 }
 0x2f3   :  { %3816 = vmatprep.subr.bf16.mxu1 %v4279_v3 }
 0x2f6   :  { %3818 = vmatpush3.bf16.msra.mxu1 %v4446_v23 }
 0x2f7   :  { %3819 = vmatprep.subr.bf16.mxu1 %v4279_v3 }
 0x2fa   :  { %3821 = vmatpush3.bf16.msra.mxu1 %v4462_v29 }
 0x2fb   :  { %3822 = vmatprep.subr.bf16.mxu1 %v4279_v3 }
 0x2fe   :  { %3824 = vmatpush3.bf16.msra.mxu1 %v4478_v35 }
 0x2ff   :  { %3825 = vmatprep.subr.bf16.mxu1 %v4279_v3 }
 0x302   :  { %3827 = vmatpush3.bf16.msra.mxu1 %v4497_v42 }
 0x303   :  { %3828 = vmatprep.subr.bf16.mxu1 %v4279_v3 }
 0x306   :  { %3830 = vmatpush3.bf16.msra.mxu1 %v4518_v50 }
 0x307   :  { %3831 = vmatprep.subr.bf16.mxu1 %v4279_v3 }
 0x30a   :  { %3833 = vmatpush3.bf16.msra.mxu1 %v4539_v58 }
 0x30b   :  { %3834 = vmatprep.subr.bf16.mxu1 %v4279_v3 }
 0x30e   :  { %3836 = vmatpush3.bf16.msra.mxu1 %v4565_v6 }
 0x30f   :  { %3861 = vmatprep.subr.bf16.mxu1 %v4279_v3 }
 0x3c4   :  { %v664_v44 = vpop.f32.mrb[4].mxu1 }
 0x3c5   :  { %v668_v45 = vadd.f32 %v664_v44, %v4693_v60  ;;  %v2989_v46 = vpop.f32.mrb[5].mxu1  ;;  %v1003_v60 = vld [vmem:[%s5487_s10 + $0x10] sm:$0xff]  ;;  %v1132_v44 = vld [vmem:[%s5488_s11 + $0x18] sm:$0xff] }
 0x3c6   :  { %v3889_v62 = vpack.c.bf16 %v1004_v61, %v1003_v60  ;;  %v1133_v46 = vld [vmem:[%s5488_s11 + $0x20] sm:$0xff] }
 0x3c7   :  { %4249 = vtanh.f32 %v668_v45  ;;  %v4897_v45 = vpack.c.bf16 %v1132_v44, %v1131_v41 }
 0x3d1   :  { %v4250_v48 = vpop.eup %4249 }
 0x3d2   :  { %v676_v49 = vsel %vm675_vm2, %v4250_v48, %v597_v40  ;;  %3023 = vmatmul.mubr.f32.vlgmr.msra.gmra.mrb[10].mxu0 %v4250_v48  ;;  %v4887_v40 = vpack.c.bf16 %v1130_v37, %v1129_v36  ;;  %v987_v48 = vsel %vm986_vm7, 1, %v4282_v7  ;;  %vm1777_vm2 = vcmp.eq.s32.totalorder %v4739_v26, 1 }
 0x3d3   :  { %3839 = vmatpush3.bf16.msra.mxu0 %v4431_v17  ;;  %3092 = vmatprep.mubr.msk.f32.mxu0 %vm4280_vm0, %v4281_v4  ;;  %vm2039_vm7 = vcmask 1045509  }
 0x3d4   :  { %3840 = vmatprep.subr.bf16.mxu0 %v4279_v3  ;;  %989 = vperm.xlu1 %4242, %v987_v48  }
 0x3d7   :  { %3842 = vmatpush3.bf16.msra.mxu0 %v4446_v23 }
 0x3d8   :  { %3843 = vmatprep.subr.bf16.mxu0 %v4279_v3 }
 0x3db   :  { %3845 = vmatpush3.bf16.msra.mxu0 %v4462_v29 }
 0x3dc   :  { %3846 = vmatprep.subr.bf16.mxu0 %v4279_v3 }
 0x3df   :  { %3848 = vmatpush3.bf16.msra.mxu0 %v4478_v35 }
 0x3e0   :  { %3849 = vmatprep.subr.bf16.mxu0 %v4279_v3 }
 0x3e3   :  { %3851 = vmatpush3.bf16.msra.mxu0 %v4497_v42 }
 0x3e4   :  { %3852 = vmatprep.subr.bf16.mxu0 %v4279_v3 }
 0x3e7   :  { %3854 = vmatpush3.bf16.msra.mxu0 %v4518_v50 }
 0x3e8   :  { %3855 = vmatprep.subr.bf16.mxu0 %v4279_v3 }
 0x3eb   :  { %3857 = vmatpush3.bf16.msra.mxu0 %v4539_v58 }
 0x3ec   :  { %3858 = vmatprep.subr.bf16.mxu0 %v4279_v3 }
 0x3ef   :  { %3860 = vmatpush3.bf16.msra.mxu0 %v4565_v6 }
 0x4a5   :  { %v743_v52 = vpop.f32.mrb[10].mxu0 }
 0x4a6   :  { %v747_v53 = vadd.f32 %v743_v52, %v4699_v5  ;;  %v3024_v54 = vpop.f32.mrb[11].mxu0  ;;  %v1007_v5 = vld [vmem:[%s5487_s10 + $0x30] sm:$0xff]  ;;  %v1136_v52 = vld [vmem:[%s5488_s11 + $0x38] sm:$0xff] }
 0x4a7   :  { %v3897_v10 = vpack.c.bf16 %v1008_v8, %v1007_v5  ;;  %v998_v5 = vld [vmem:[%s5489_s4 + $0x28] sm:$0xff]  ;;  %v999_v8 = vld [vmem:[%s5489_s4 + $0x30] sm:$0xff] }
 0x4a8   :  { %4251 = vtanh.f32 %v747_v53  ;;  %v1138_v53 = vld [vmem:[%s5488_s11 + $0x48] sm:$0xff] }
 0x4a9   :  { %v4929_v54 = vpack.c.bf16 %v1138_v53, %v1137_v63 }
 0x4b2   :  { %v4252_v56 = vpop.eup %4251 }
 0x4b3   :  { %v755_v57 = vsel %vm754_vm4, %v4252_v56, %v676_v49  ;;  %3058 = vmatmul.mubr.f32.vlgmr.msra.gmra.mrb[6].mxu1 %v4252_v56  ;;  %v4909_v49 = vpack.c.bf16 %v1134_v47, %v1133_v46  ;;  %v1140_v56 = vld [vmem:[%s5488_s11 + $0x58] sm:$0xff]  ;;  %vm2033_vm4 = vcmask 1042434  }
 0x4b4   :  { %3863 = vmatpush3.bf16.msra.mxu1 %v4431_v17  ;;  %3127 = vmatprep.mubr.msk.f32.mxu1 %vm4280_vm0, %v4281_v4  ;;  %v908_v17 = vsel %vm907_vm5, 1, %v4282_v7  ;;  %v4919_v7 = vpack.c.bf16 %v1136_v52, %v1135_v51  ;;  %vm2035_vm5 = vcmask 1043459  }
 0x4b5   :  { %3864 = vmatprep.subr.bf16.mxu1 %v4279_v3  ;;  %910 = vperm.xlu0 %4241, %v908_v17   ;;  %v1141_v17 = vld [vmem:[%s5488_s11 + $0x60] sm:$0xff] }
 0x4b8   :  { %3866 = vmatpush3.bf16.msra.mxu1 %v4446_v23 }
 0x4b9   :  { %3867 = vmatprep.subr.bf16.mxu1 %v4279_v3 }
 0x4bc   :  { %3869 = vmatpush3.bf16.msra.mxu1 %v4462_v29 }
 0x4bd   :  { %3870 = vmatprep.subr.bf16.mxu1 %v4279_v3 }
 0x4c0   :  { %3872 = vmatpush3.bf16.msra.mxu1 %v4478_v35 }
 0x4c1   :  { %3873 = vmatprep.subr.bf16.mxu1 %v4279_v3 }
 0x4c4   :  { %3875 = vmatpush3.bf16.msra.mxu1 %v4497_v42  ;;  %v832_v42 = vpop.permute.xlu1 %831 }
 0x4c5   :  { %3876 = vmatprep.subr.bf16.mxu1 %v4279_v3  ;;  %vm833_vm6 = vcmp.eq.s32.totalorder %v832_v42, 1  ;;  %v1144_v42 = vld [vmem:[%s5488_s11 + $0x78] sm:$0xff] }
 0x4c8   :  { %3878 = vmatpush3.bf16.msra.mxu1 %v4518_v50  ;;  %v990_v24 = vpop.permute.xlu1 %989 }
 0x4c9   :  { %3879 = vmatprep.subr.bf16.mxu1 %v4279_v3  ;;  %vm991_vm9 = vcmp.eq.s32.totalorder %v990_v24, 1 }
 0x4cc   :  { %3881 = vmatpush3.bf16.msra.mxu1 %v4539_v58 }
 0x4cd   :  { %3882 = vmatprep.subr.bf16.mxu1 %v4279_v3 }
 0x4d0   :  { %3884 = vmatpush3.bf16.msra.mxu1 %v4565_v6  ;;  %v1001_v6 = vld [vmem:[%s5487_s10] sm:$0xff] }
 0x4d1   :  { %3917 = vmatprep.subr.bf16.mxu1 %v4279_v3  ;;  %v3885_v59 = vpack.c.bf16 %v1002_v43, %v1001_v6 }
 0x4d3   :  { %3886 = vmatprep.subr.bf16.mxu0 %v3885_v59 }
 0x534   :  { %v911_v60 = vpop.permute.xlu0 %910 }
 0x535   :  { %vm912_vm8 = vcmp.eq.s32.totalorder %v911_v60, 1 }
 0x586   :  { %v822_v23 = vpop.f32.mrb[6].mxu1 }
 0x587   :  { %v826_v29 = vadd.f32 %v822_v23, %v4697_v1  ;;  %v3059_v35 = vpop.f32.mrb[7].mxu1  ;;  %v1006_v1 = vld [vmem:[%s5487_s10 + $0x28] sm:$0xff] }
 0x588   :  { %v3893_v2 = vpack.c.bf16 %v1006_v1, %v1005_v0  ;;  %v1142_v23 = vld [vmem:[%s5488_s11 + $0x68] sm:$0xff]  ;;  %v1143_v35 = vld [vmem:[%s5488_s11 + $0x70] sm:$0xff]  ;;  %v996_v1 = vld [vmem:[%s5489_s4 + $0x18] sm:$0xff] }
 0x589   :  { %4253 = vtanh.f32 %v826_v29  ;;  %v4949_v29 = vpack.c.bf16 %v1142_v23, %v1141_v17 }
 0x593   :  { %v4254_v50 = vpop.eup %4253 }
 0x594   :  { %v4824_v58 = vsel %vm833_vm6, %v4254_v50, %v755_v57  ;;  %3093 = vmatmul.mubr.f32.vlgmr.msra.gmra.mrb[12].mxu0 %v4254_v50  ;;  %v4939_v57 = vpack.c.bf16 %v1140_v56, %v1139_v55  ;;  %v4959_v50 = vpack.c.bf16 %v1144_v42, %v1143_v35  ;;  %vm2037_vm6 = vcmask 1044484  }
 0x595   :  { %3888 = vmatpush3.bf16.msra.mxu0 %v3885_v59  ;;  %3162 = vmatprep.mubr.f32.mxu0 %v993_v38 }
 0x596   :  { %3890 = vmatprep.subr.bf16.mxu0 %v3889_v62 }
 0x599   :  { %3892 = vmatpush3.bf16.msra.mxu0 %v3889_v62 }
 0x59a   :  { %3894 = vmatprep.subr.bf16.mxu0 %v3893_v2 }
 0x59d   :  { %3896 = vmatpush3.bf16.msra.mxu0 %v3893_v2  ;;  %v997_v2 = vld [vmem:[%s5489_s4 + $0x20] sm:$0xff] }
 0x59e   :  { %3898 = vmatprep.subr.bf16.mxu0 %v3897_v10 }
 0x5a1   :  { %3900 = vmatpush3.bf16.msra.mxu0 %v3897_v10  ;;  %v1000_v10 = vld [vmem:[%s5489_s4 + $0x38] sm:$0xff] }
 0x5a2   :  { %3902 = vmatprep.subr.bf16.mxu0 %v3901_v21 }
 0x5a5   :  { %3904 = vmatpush3.bf16.msra.mxu0 %v3901_v21 }
 0x5a6   :  { %3906 = vmatprep.subr.bf16.mxu0 %v3905_v27 }
 0x5a9   :  { %3908 = vmatpush3.bf16.msra.mxu0 %v3905_v27 }
 0x5aa   :  { %3910 = vmatprep.subr.bf16.mxu0 %v3909_v31 }
 0x5ad   :  { %3912 = vmatpush3.bf16.msra.mxu0 %v3909_v31 }
 0x5ae   :  { %3914 = vmatprep.subr.bf16.mxu0 %v3913_v34 }
 0x5b1   :  { %3916 = vmatpush3.bf16.msra.mxu0 %v3913_v34 }
 0x5b2   :  { %3941 = vmatprep.subr.bf16.mxu0 %v4279_v3 }
 0x5b4   :  { %3163 = vmatmul.mubr.f32.vlgmr.msra.gmra.mrb[14].mxu0 %v994_v39 }
 0x5b5   :  { %3943 = vmatpush3.bf16.msra.mxu0 %v4887_v40 }
 0x5b6   :  { %3944 = vmatprep.subr.bf16.mxu0 %v4279_v3 }
 0x5b9   :  { %3946 = vmatpush3.bf16.msra.mxu0 %v4897_v45 }
 0x5ba   :  { %3947 = vmatprep.subr.bf16.mxu0 %v4279_v3 }
 0x5bd   :  { %3949 = vmatpush3.bf16.msra.mxu0 %v4909_v49 }
 0x5be   :  { %3950 = vmatprep.subr.bf16.mxu0 %v4279_v3 }
 0x5c1   :  { %3952 = vmatpush3.bf16.msra.mxu0 %v4919_v7 }
 0x5c2   :  { %3953 = vmatprep.subr.bf16.mxu0 %v4279_v3 }
 0x5c5   :  { %3955 = vmatpush3.bf16.msra.mxu0 %v4929_v54 }
 0x5c6   :  { %3956 = vmatprep.subr.bf16.mxu0 %v4279_v3 }
 0x5c9   :  { %3958 = vmatpush3.bf16.msra.mxu0 %v4939_v57 }
 0x5ca   :  { %3959 = vmatprep.subr.bf16.mxu0 %v4279_v3 }
 0x5cd   :  { %3961 = vmatpush3.bf16.msra.mxu0 %v4949_v29 }
 0x5ce   :  { %3962 = vmatprep.subr.bf16.mxu0 %v4279_v3 }
 0x5d1   :  { %3964 = vmatpush3.bf16.msra.mxu0 %v4959_v50 }
 0x5d2   :  { %3989 = vmatprep.subr.bf16.mxu0 %v4279_v3 }
 0x667   :  { %v901_v6 = vpop.f32.mrb[12].mxu0 }
 0x668   :  { %v905_v43 = vadd.f32 %v901_v6, %v4703_v11  ;;  %v3094_v59 = vpop.f32.mrb[13].mxu0  ;;  %v995_v11 = vld [vmem:[%s5489_s4 + $0x10] sm:$0xff] }
 0x669   :  { %3165 = vmatprep.mubr.f32.mxu0 %v995_v11 }
 0x66a   :  { %4255 = vtanh.f32 %v905_v43  ;;  %3166 = vmatmul.mubr.f32.gmra.mrb[16].mxu0 %v996_v1  ;;  %v1855_v1 = vld [vmem:[%s5491_s14 + $0x20] sm:$0xff] }
 0x66b   :  { %3168 = vmatprep.mubr.f32.mxu0 %v997_v2  ;;  %v1856_v2 = vld [vmem:[%s5491_s14 + $0x28] sm:$0xff] }
 0x66e   :  { %3169 = vmatmul.mubr.f32.gmra.mrb[18].mxu0 %v998_v5  ;;  %v4116_v5 = vpack.c.bf16 %v1856_v2, %v1855_v1  ;;  %v1783_v1 = vld [vmem:[%s5493_s5 + $0x20] sm:$0xff] }
 0x66f   :  { %3171 = vmatprep.mubr.f32.mxu0 %v999_v8  ;;  %v1857_v8 = vld [vmem:[%s5491_s14 + $0x30] sm:$0xff] }
 0x672   :  { %3172 = vmatmul.mubr.f32.gmra.mrb[20].mxu0 %v1000_v10  ;;  %v1858_v10 = vld [vmem:[%s5491_s14 + $0x38] sm:$0xff] }
 0x673   :  { %3241 = vmatprep.mubr.msk.f32.mxu0 %vm4280_vm0, %v4281_v4 }
 0x674   :  { %v4256_v61 = vpop.eup %4255 }
 0x675   :  { %v913_v62 = vsel %vm912_vm8, %v4256_v61, %v4824_v58  ;;  %3128 = vmatmul.mubr.f32.vlgmr.msra.gmra.mrb[8].mxu1 %v4256_v61  ;;  %vm2041_vm8 = vcmask 1046534  }
 0x676   :  { %3919 = vmatpush3.bf16.msra.mxu1 %v4887_v40  ;;  %3206 = vmatprep.mubr.msk.f32.mxu1 %vm4280_vm0, %v4281_v4 }
 0x677   :  { %3920 = vmatprep.subr.bf16.mxu1 %v4279_v3 }
 0x67a   :  { %3922 = vmatpush3.bf16.msra.mxu1 %v4897_v45 }
 0x67b   :  { %3923 = vmatprep.subr.bf16.mxu1 %v4279_v3 }
 0x67e   :  { %3925 = vmatpush3.bf16.msra.mxu1 %v4909_v49 }
 0x67f   :  { %3926 = vmatprep.subr.bf16.mxu1 %v4279_v3 }
 0x682   :  { %3928 = vmatpush3.bf16.msra.mxu1 %v4919_v7 }
 0x683   :  { %3929 = vmatprep.subr.bf16.mxu1 %v4279_v3 }
 0x686   :  { %3931 = vmatpush3.bf16.msra.mxu1 %v4929_v54 }
 0x687   :  { %3932 = vmatprep.subr.bf16.mxu1 %v4279_v3  ;;  %v3164_v58 = vpop.f32.mrb[14].mxu0 }
 0x688   :  { %v1090_v0 = vpop.f32.mrb[15].mxu0  ;;  %v1096_v44 = vadd.f32 %v3164_v58, %v5028_v28 }
 0x689   :  { %v1091_v30 = vadd.f32 %v5028_v28, %v1090_v0 }
 0x68a   :  { %3934 = vmatpush3.bf16.msra.mxu1 %v4939_v57 }
 0x68b   :  { %3935 = vmatprep.subr.bf16.mxu1 %v4279_v3 }
 0x68e   :  { %3937 = vmatpush3.bf16.msra.mxu1 %v4949_v29 }
 0x68f   :  { %3938 = vmatprep.subr.bf16.mxu1 %v4279_v3 }
 0x692   :  { %3940 = vmatpush3.bf16.msra.mxu1 %v4959_v50 }
 0x693   :  { %3965 = vmatprep.subr.bf16.mxu1 %v4279_v3 }
 0x695   :  { %3207 = vmatmul.mubr.f32.vlgmr.msra.gmra.mrb[10].mxu1 %v4281_v4 }
 0x696   :  { %3967 = vmatpush3.bf16.msra.mxu1 %v4887_v40  ;;  %3276 = vmatprep.mubr.msk.f32.mxu1 %vm4280_vm0, %v4281_v4 }
 0x697   :  { %3968 = vmatprep.subr.bf16.mxu1 %v4279_v3 }
 0x69a   :  { %3970 = vmatpush3.bf16.msra.mxu1 %v4897_v45 }
 0x69b   :  { %3971 = vmatprep.subr.bf16.mxu1 %v4279_v3 }
 0x69e   :  { %3973 = vmatpush3.bf16.msra.mxu1 %v4909_v49 }
 0x69f   :  { %3974 = vmatprep.subr.bf16.mxu1 %v4279_v3 }
 0x6a2   :  { %3976 = vmatpush3.bf16.msra.mxu1 %v4919_v7 }
 0x6a3   :  { %3977 = vmatprep.subr.bf16.mxu1 %v4279_v3 }
 0x6a6   :  { %3979 = vmatpush3.bf16.msra.mxu1 %v4929_v54 }
 0x6a7   :  { %3980 = vmatprep.subr.bf16.mxu1 %v4279_v3 }
 0x6aa   :  { %3982 = vmatpush3.bf16.msra.mxu1 %v4939_v57 }
 0x6ab   :  { %3983 = vmatprep.subr.bf16.mxu1 %v4279_v3 }
 0x6ae   :  { %3985 = vmatpush3.bf16.msra.mxu1 %v4949_v29 }
 0x6af   :  { %3986 = vmatprep.subr.bf16.mxu1 %v4279_v3 }
 0x6b2   :  { %3988 = vmatpush3.bf16.msra.mxu1 %v4959_v50 }
 0x6b3   :  { %4013 = vmatprep.subr.bf16.mxu1 %v4279_v3 }
 0x73d   :  { %v3167_v14 = vpop.f32.mrb[16].mxu0 }
 0x73e   :  { %v1100_v36 = vpop.f32.mrb[17].mxu0  ;;  %v1106_v15 = vadd.f32 %v3167_v14, %v5028_v28  ;;  %v1837_v14 = vld [vmem:[%s5492_s13 + $0x10] sm:$0xff] }
 0x73f   :  { %v1101_v16 = vadd.f32 %v5028_v28, %v1100_v36  ;;  %v1838_v36 = vld [vmem:[%s5492_s13 + $0x18] sm:$0xff] }
 0x741   :  { %v5050_v37 = vpop.f32.mrb[18].mxu0 }
 0x742   :  { %v5052_v38 = vpop.f32.mrb[19].mxu0  ;;  %v1116_v19 = vadd.f32 %v5050_v37, %v5028_v28 }
 0x743   :  { %v1111_v18 = vadd.f32 %v5028_v28, %v5052_v38 }
 0x745   :  { %v5054_v39 = vpop.f32.mrb[20].mxu0 }
 0x746   :  { %v5056_v41 = vpop.f32.mrb[21].mxu0 }
 0x748   :  { %v980_v12 = vpop.f32.mrb[8].mxu1 }
 0x749   :  { %v984_v13 = vadd.f32 %v980_v12, %v4701_v9  ;;  %v3129_v21 = vpop.f32.mrb[9].mxu1  ;;  %v4119_v12 = vpack.c.bf16 %v1858_v10, %v1857_v8  ;;  %v2008_v8 = vld [vmem:[%s5494_s15 + $0x8] sm:$0xff] }
 0x74a   :  { %v1860_v21 = vld [vmem:[%s5491_s14 + $0x48] sm:$0xff] }
 0x74b   :  { %4257 = vtanh.f32 %v984_v13  ;;  %v1859_v13 = vld [vmem:[%s5491_s14 + $0x40] sm:$0xff] }
 0x74c   :  { %v4122_v24 = vpack.c.bf16 %v1860_v21, %v1859_v13  ;;  %v1784_v21 = vld [vmem:[%s5493_s5 + $0x28] sm:$0xff] }
 0x755   :  { %v4258_v25 = vpop.eup %4257 }
 0x756   :  { %v5023_v27 = vsel %vm991_vm9, %v4258_v25, %v913_v62  ;;  %v1121_v25 = vadd.f32 %v5028_v28, %v5056_v41  ;;  %v4137_v41 = vpack.c.bf16 %v1838_v36, %v1837_v14  ;;  %v1785_v14 = vld [vmem:[%s5493_s5 + $0x30] sm:$0xff]  ;;  %vm2043_vm9 = vcmask 1047559  }
 0x768   :  { %v1213_v31 = vpop.f32.mrb[10].mxu1 }
 0x769   :  { %v1217_v32 = vadd.f32 %v1213_v31, %v1091_v30  ;;  %v3208_v33 = vpop.f32.mrb[11].mxu1 }
 0x76a   :  { %v1835_v33 = vld [vmem:[%s5492_s13] sm:$0xff] }
 0x76b   :  { %4259 = vtanh.f32 %v1217_v32 }
 0x775   :  { %v4260_v9 = vpop.eup %4259 }
 0x776   :  { %v1225_v34 = vsel %vm1224_vm10, %v4260_v9, 0.0  ;;  %3242 = vmatmul.mubr.f32.vlgmr.msra.gmra.mrb[22].mxu0 %v4260_v9  ;;  %v1836_v9 = vld [vmem:[%s5492_s13 + $0x8] sm:$0xff] }
 0x777   :  { %3991 = vmatpush3.bf16.msra.mxu0 %v4887_v40  ;;  %3311 = vmatprep.mubr.msk.f32.mxu0 %vm4280_vm0, %v4281_v4 }
 0x778   :  { %3992 = vmatprep.subr.bf16.mxu0 %v4279_v3 }
 0x77b   :  { %3994 = vmatpush3.bf16.msra.mxu0 %v4897_v45 }
 0x77c   :  { %3995 = vmatprep.subr.bf16.mxu0 %v4279_v3 }
 0x77f   :  { %3997 = vmatpush3.bf16.msra.mxu0 %v4909_v49 }
 0x780   :  { %3998 = vmatprep.subr.bf16.mxu0 %v4279_v3 }
 0x783   :  { %4000 = vmatpush3.bf16.msra.mxu0 %v4919_v7 }
 0x784   :  { %4001 = vmatprep.subr.bf16.mxu0 %v4279_v3 }
 0x787   :  { %4003 = vmatpush3.bf16.msra.mxu0 %v4929_v54 }
 0x788   :  { %4004 = vmatprep.subr.bf16.mxu0 %v4279_v3 }
 0x78b   :  { %4006 = vmatpush3.bf16.msra.mxu0 %v4939_v57 }
 0x78c   :  { %4007 = vmatprep.subr.bf16.mxu0 %v4279_v3 }
 0x78f   :  { %4009 = vmatpush3.bf16.msra.mxu0 %v4949_v29 }
 0x790   :  { %4010 = vmatprep.subr.bf16.mxu0 %v4279_v3 }
 0x793   :  { %4012 = vmatpush3.bf16.msra.mxu0 %v4959_v50 }
 0x794   :  { %4037 = vmatprep.subr.bf16.mxu0 %v4279_v3 }
 0x849   :  { %v1292_v46 = vpop.f32.mrb[22].mxu0 }
 0x84a   :  { %v1296_v47 = vadd.f32 %v1292_v46, %v1096_v44  ;;  %v3243_v48 = vpop.f32.mrb[23].mxu0  ;;  %v1840_v44 = vld [vmem:[%s5492_s13 + $0x28] sm:$0xff] }
 0x84b   :  { %v4140_v46 = vpack.c.bf16 %v1840_v44, %v1839_v22  ;;  %v1842_v48 = vld [vmem:[%s5492_s13 + $0x38] sm:$0xff] }
 0x84c   :  { %4261 = vtanh.f32 %v1296_v47  ;;  %v1841_v47 = vld [vmem:[%s5492_s13 + $0x30] sm:$0xff] }
 0x856   :  { %v4262_v51 = vpop.eup %4261 }
 0x857   :  { %3277 = vmatmul.mubr.f32.vlgmr.msra.gmra.mrb[12].mxu1 %v4262_v51  ;;  %v1304_v52 = vsel %vm1303_vm11, %v4262_v51, %v1225_v34  ;;  %v4134_v34 = vpack.c.bf16 %v1836_v9, %v1835_v33  ;;  %v4143_v51 = vpack.c.bf16 %v1842_v48, %v1841_v47  ;;  %v2010_v33 = vld [vmem:[%s5494_s15 + $0x18] sm:$0xff] }
 0x858   :  { %4015 = vmatpush3.bf16.msra.mxu1 %v4887_v40  ;;  %3346 = vmatprep.mubr.msk.f32.mxu1 %vm4280_vm0, %v4281_v4  ;;  %v1786_v47 = vld [vmem:[%s5493_s5 + $0x38] sm:$0xff] }
 0x859   :  { %4016 = vmatprep.subr.bf16.mxu1 %v4279_v3 }
 0x85c   :  { %4018 = vmatpush3.bf16.msra.mxu1 %v4897_v45 }
 0x85d   :  { %4019 = vmatprep.subr.bf16.mxu1 %v4279_v3 }
 0x860   :  { %4021 = vmatpush3.bf16.msra.mxu1 %v4909_v49 }
 0x861   :  { %4022 = vmatprep.subr.bf16.mxu1 %v4279_v3 }
 0x864   :  { %4024 = vmatpush3.bf16.msra.mxu1 %v4919_v7 }
 0x865   :  { %4025 = vmatprep.subr.bf16.mxu1 %v4279_v3 }
 0x868   :  { %4027 = vmatpush3.bf16.msra.mxu1 %v4929_v54 }
 0x869   :  { %4028 = vmatprep.subr.bf16.mxu1 %v4279_v3 }
 0x86c   :  { %4030 = vmatpush3.bf16.msra.mxu1 %v4939_v57 }
 0x86d   :  { %4031 = vmatprep.subr.bf16.mxu1 %v4279_v3 }
 0x870   :  { %4033 = vmatpush3.bf16.msra.mxu1 %v4949_v29 }
 0x871   :  { %4034 = vmatprep.subr.bf16.mxu1 %v4279_v3 }
 0x874   :  { %4036 = vmatpush3.bf16.msra.mxu1 %v4959_v50 }
 0x875   :  { %4061 = vmatprep.subr.bf16.mxu1 %v4279_v3 }
 0x92a   :  { %v1371_v63 = vpop.f32.mrb[12].mxu1 }
 0x92b   :  { %v1375_v53 = vadd.f32 %v1371_v63, %v1101_v16  ;;  %v3278_v55 = vpop.f32.mrb[13].mxu1  ;;  %v1844_v16 = vld [vmem:[%s5492_s13 + $0x48] sm:$0xff] }
 0x92c   :  { %v1846_v55 = vld [vmem:[%s5492_s13 + $0x58] sm:$0xff] }
 0x92d   :  { %4263 = vtanh.f32 %v1375_v53  ;;  %v1845_v53 = vld [vmem:[%s5492_s13 + $0x50] sm:$0xff] }
 0x937   :  { %v4264_v56 = vpop.eup %4263 }
 0x938   :  { %3312 = vmatmul.mubr.f32.vlgmr.msra.gmra.mrb[24].mxu0 %v4264_v56  ;;  %v1383_v17 = vsel %vm1382_vm12, %v4264_v56, %v1304_v52  ;;  %v1843_v52 = vld [vmem:[%s5492_s13 + $0x40] sm:$0xff]  ;;  %v4149_v56 = vpack.c.bf16 %v1846_v55, %v1845_v53 }
 0x939   :  { %4039 = vmatpush3.bf16.msra.mxu0 %v4887_v40  ;;  %3381 = vmatprep.mubr.msk.f32.mxu0 %vm4280_vm0, %v4281_v4  ;;  %v4146_v63 = vpack.c.bf16 %v1844_v16, %v1843_v52 }
 0x93a   :  { %4040 = vmatprep.subr.bf16.mxu0 %v4279_v3 }
 0x93d   :  { %4042 = vmatpush3.bf16.msra.mxu0 %v4897_v45 }
 0x93e   :  { %4043 = vmatprep.subr.bf16.mxu0 %v4279_v3 }
 0x941   :  { %4045 = vmatpush3.bf16.msra.mxu0 %v4909_v49 }
 0x942   :  { %4046 = vmatprep.subr.bf16.mxu0 %v4279_v3 }
 0x945   :  { %4048 = vmatpush3.bf16.msra.mxu0 %v4919_v7 }
 0x946   :  { %4049 = vmatprep.subr.bf16.mxu0 %v4279_v3 }
 0x949   :  { %4051 = vmatpush3.bf16.msra.mxu0 %v4929_v54 }
 0x94a   :  { %4052 = vmatprep.subr.bf16.mxu0 %v4279_v3 }
 0x94d   :  { %4054 = vmatpush3.bf16.msra.mxu0 %v4939_v57 }
 0x94e   :  { %4055 = vmatprep.subr.bf16.mxu0 %v4279_v3 }
 0x951   :  { %4057 = vmatpush3.bf16.msra.mxu0 %v4949_v29 }
 0x952   :  { %4058 = vmatprep.subr.bf16.mxu0 %v4279_v3 }
 0x955   :  { %4060 = vmatpush3.bf16.msra.mxu0 %v4959_v50 }
 0x956   :  { %4085 = vmatprep.subr.bf16.mxu0 %v4279_v3 }
 0xa0b   :  { %v1450_v23 = vpop.f32.mrb[24].mxu0 }
 0xa0c   :  { %v1454_v35 = vadd.f32 %v1450_v23, %v1106_v15  ;;  %v3313_v42 = vpop.f32.mrb[25].mxu0  ;;  %v1848_v15 = vld [vmem:[%s5492_s13 + $0x68] sm:$0xff] }
 0xa0d   :  { %v1850_v42 = vld [vmem:[%s5492_s13 + $0x78] sm:$0xff] }
 0xa0e   :  { %4265 = vtanh.f32 %v1454_v35  ;;  %v1849_v35 = vld [vmem:[%s5492_s13 + $0x70] sm:$0xff] }
 0xa18   :  { %v4266_v6 = vpop.eup %4265 }
 0xa19   :  { %3347 = vmatmul.mubr.f32.vlgmr.msra.gmra.mrb[14].mxu1 %v4266_v6  ;;  %v1462_v43 = vsel %vm1461_vm13, %v4266_v6, %v1383_v17  ;;  %v1847_v17 = vld [vmem:[%s5492_s13 + $0x60] sm:$0xff]  ;;  %v4155_v6 = vpack.c.bf16 %v1850_v42, %v1849_v35 }
 0xa1a   :  { %4063 = vmatpush3.bf16.msra.mxu1 %v4887_v40  ;;  %3416 = vmatprep.mubr.msk.f32.mxu1 %vm4280_vm0, %v4281_v4  ;;  %v4152_v23 = vpack.c.bf16 %v1848_v15, %v1847_v17  ;;  %v1829_v17 = vrot.slane %v1786_v47, 4  ;;  %v2013_v15 = vld [vmem:[%s5494_s15 + $0x30] sm:$0xff] }
 0xa1b   :  { %4064 = vmatprep.subr.bf16.mxu1 %v4279_v3 }
 0xa1e   :  { %4066 = vmatpush3.bf16.msra.mxu1 %v4897_v45 }
 0xa1f   :  { %4067 = vmatprep.subr.bf16.mxu1 %v4279_v3 }
 0xa22   :  { %4069 = vmatpush3.bf16.msra.mxu1 %v4909_v49 }
 0xa23   :  { %4070 = vmatprep.subr.bf16.mxu1 %v4279_v3 }
 0xa26   :  { %4072 = vmatpush3.bf16.msra.mxu1 %v4919_v7 }
 0xa27   :  { %4073 = vmatprep.subr.bf16.mxu1 %v4279_v3 }
 0xa2a   :  { %4075 = vmatpush3.bf16.msra.mxu1 %v4929_v54 }
 0xa2b   :  { %4076 = vmatprep.subr.bf16.mxu1 %v4279_v3 }
 0xa2e   :  { %4078 = vmatpush3.bf16.msra.mxu1 %v4939_v57 }
 0xa2f   :  { %4079 = vmatprep.subr.bf16.mxu1 %v4279_v3 }
 0xa32   :  { %4081 = vmatpush3.bf16.msra.mxu1 %v4949_v29 }
 0xa33   :  { %4082 = vmatprep.subr.bf16.mxu1 %v4279_v3 }
 0xa36   :  { %4084 = vmatpush3.bf16.msra.mxu1 %v4959_v50 }
 0xa37   :  { %4109 = vmatprep.subr.bf16.mxu1 %v4279_v3 }
 0xaec   :  { %v1529_v59 = vpop.f32.mrb[14].mxu1 }
 0xaed   :  { %v1533_v60 = vadd.f32 %v1529_v59, %v1111_v18  ;;  %v3348_v61 = vpop.f32.mrb[15].mxu1  ;;  %v1862_v18 = vld [vmem:[%s5491_s14 + $0x58] sm:$0xff] }
 0xaef   :  { %4267 = vtanh.f32 %v1533_v60  ;;  %v1863_v60 = vld [vmem:[%s5491_s14 + $0x60] sm:$0xff] }
 0xaf9   :  { %v4268_v62 = vpop.eup %4267 }
 0xafa   :  { %3382 = vmatmul.mubr.f32.vlgmr.msra.gmra.mrb[26].mxu0 %v4268_v62  ;;  %v1541_v11 = vsel %vm1540_vm14, %v4268_v62, %v1462_v43  ;;  %v1861_v43 = vld [vmem:[%s5491_s14 + $0x50] sm:$0xff] }
 0xafb   :  { %4087 = vmatpush3.bf16.msra.mxu0 %v4887_v40  ;;  %3451 = vmatprep.mubr.msk.f32.mxu0 %vm4280_vm0, %v4281_v4  ;;  %v4125_v59 = vpack.c.bf16 %v1862_v18, %v1861_v43  ;;  %v1865_v62 = vld [vmem:[%s5491_s14 + $0x70] sm:$0xff] }
 0xafc   :  { %4088 = vmatprep.subr.bf16.mxu0 %v4279_v3 }
 0xaff   :  { %4090 = vmatpush3.bf16.msra.mxu0 %v4897_v45 }
 0xb00   :  { %4091 = vmatprep.subr.bf16.mxu0 %v4279_v3 }
 0xb03   :  { %4093 = vmatpush3.bf16.msra.mxu0 %v4909_v49 }
 0xb04   :  { %4094 = vmatprep.subr.bf16.mxu0 %v4279_v3 }
 0xb07   :  { %4096 = vmatpush3.bf16.msra.mxu0 %v4919_v7 }
 0xb08   :  { %4097 = vmatprep.subr.bf16.mxu0 %v4279_v3 }
 0xb0b   :  { %4099 = vmatpush3.bf16.msra.mxu0 %v4929_v54 }
 0xb0c   :  { %4100 = vmatprep.subr.bf16.mxu0 %v4279_v3 }
 0xb0f   :  { %4102 = vmatpush3.bf16.msra.mxu0 %v4939_v57  ;;  %v1851_v57 = vld [vmem:[%s5491_s14] sm:$0xff] }
 0xb10   :  { %4103 = vmatprep.subr.bf16.mxu0 %v4279_v3 }
 0xb13   :  { %4105 = vmatpush3.bf16.msra.mxu0 %v4949_v29  ;;  %v1852_v29 = vld [vmem:[%s5491_s14 + $0x8] sm:$0xff] }
 0xb14   :  { %4106 = vmatprep.subr.bf16.mxu0 %v4279_v3  ;;  %v4110_v58 = vpack.c.bf16 %v1852_v29, %v1851_v57  ;;  %v1781_v29 = vld [vmem:[%s5493_s5 + $0x10] sm:$0xff] }
 0xb17   :  { %4108 = vmatpush3.bf16.msra.mxu0 %v4959_v50  ;;  %v1853_v50 = vld [vmem:[%s5491_s14 + $0x10] sm:$0xff] }
 0xb18   :  { %4133 = vmatprep.subr.bf16.mxu0 %v4279_v3  ;;  %v4113_v0 = vpack.c.bf16 %v1854_v20, %v1853_v50 }
 0xbcd   :  { %v1608_v40 = vpop.f32.mrb[26].mxu0 }
 0xbce   :  { %v1612_v45 = vadd.f32 %v1608_v40, %v1116_v19  ;;  %v3383_v49 = vpop.f32.mrb[27].mxu0  ;;  %v1126_v40 = vadd.f32 %v5054_v39, %v5028_v28  ;;  %v1782_v28 = vld [vmem:[%s5493_s5 + $0x18] sm:$0xff]  ;;  %v1799_v39 = vrot.slane %v1781_v29, 4 }
 0xbcf   :  { %v1780_v49 = vld [vmem:[%s5493_s5 + $0x8] sm:$0xff]  ;;  %v1805_v2 = vrot.slane %v1782_v28, 4 }
 0xbd0   :  { %4269 = vtanh.f32 %v1612_v45  ;;  %v1779_v45 = vld [vmem:[%s5493_s5] sm:$0xff]  ;;  %v1800_v10 = vmax.f32 %v1781_v29, %v1799_v39 }
 0xbd1   :  { %v1787_v50 = vrot.slane %v1779_v45, 4 }
 0xbd2   :  { %v1801_v9 = vrot.slane %v1800_v10, 2 }
 0xbd3   :  { %v1788_v20 = vmax.f32 %v1779_v45, %v1787_v50  ;;  %v2017_v50 = vld [vmem:[%s5494_s15 + $0x50] sm:$0xff] }
 0xbd4   :  { %v1802_v48 = vmax.f32 %v1800_v10, %v1801_v9 }
 0xbd6   :  { %v1803_v35 = vrot.slane %v1802_v48, 1 }
 0xbda   :  { %v4270_v7 = vpop.eup %4269 }
 0xbdb   :  { %3417 = vmatmul.mubr.f32.vlgmr.msra.gmra.mrb[16].mxu1 %v4270_v7  ;;  %v1620_v54 = vsel %vm1619_vm15, %v4270_v7, %v1541_v11  ;;  %v1866_v11 = vld [vmem:[%s5491_s14 + $0x78] sm:$0xff] }
 0xbdc   :  { %3486 = vmatprep.mubr.msk.f32.mxu1 %vm4280_vm0, %v4281_v4  ;;  %4111 = vmatpush3.bf16.msra.mxu1 %v4110_v58  ;;  %v4131_v19 = vpack.c.bf16 %v1866_v11, %v1865_v62  ;;  %v1793_v58 = vrot.slane %v1780_v49, 4  ;;  %v2015_v62 = vld [vmem:[%s5494_s15 + $0x40] sm:$0xff]  ;;  %v2016_v11 = vld [vmem:[%s5494_s15 + $0x48] sm:$0xff] }
 0xbdd   :  { %4112 = vmatprep.subr.bf16.mxu1 %v4279_v3 }
 0xbe0   :  { %4114 = vmatpush3.bf16.msra.mxu1 %v4113_v0  ;;  %v1794_v0 = vmax.f32 %v1780_v49, %v1793_v58  ;;  %v2018_v58 = vld [vmem:[%s5494_s15 + $0x58] sm:$0xff] }
 0xbe1   :  { %4115 = vmatprep.subr.bf16.mxu1 %v4279_v3 }
 0xbe2   :  { %v1795_v13 = vrot.slane %v1794_v0, 2 }
 0xbe4   :  { %4117 = vmatpush3.bf16.msra.mxu1 %v4116_v5  ;;  %v2007_v5 = vld [vmem:[%s5494_s15] sm:$0xff] }
 0xbe5   :  { %4118 = vmatprep.subr.bf16.mxu1 %v4279_v3 }
 0xbe8   :  { %4120 = vmatpush3.bf16.msra.mxu1 %v4119_v12  ;;  %v1789_v12 = vrot.slane %v1788_v20, 2 }
 0xbe9   :  { %4121 = vmatprep.subr.bf16.mxu1 %v4279_v3 }
 0xbea   :  { %v1790_v36 = vmax.f32 %v1788_v20, %v1789_v12  ;;  %v2019_v12 = vld [vmem:[%s5494_s15 + $0x60] sm:$0xff] }
 0xbec   :  { %4123 = vmatpush3.bf16.msra.mxu1 %v4122_v24  ;;  %v1811_v24 = vrot.slane %v1783_v1, 4  ;;  %v1791_v52 = vrot.slane %v1790_v36, 1 }
 0xbed   :  { %4124 = vmatprep.subr.bf16.mxu1 %v4279_v3 }
 0xbee   :  { %v1812_v26 = vmax.f32 %v1783_v1, %v1811_v24 }
 0xbf0   :  { %4126 = vmatpush3.bf16.msra.mxu1 %v4125_v59  ;;  %v1813_v53 = vrot.slane %v1812_v26, 2 }
 0xbf1   :  { %4127 = vmatprep.subr.bf16.mxu1 %v4279_v3 }
 0xbf2   :  { %v1814_v59 = vmax.f32 %v1812_v26, %v1813_v53  ;;  %v2126_v26 = vld [vmem:[%s5495_s17] sm:$0xff] }
 0xbf3   :  { %v2134_v53 = vld [vmem:[%s5495_s17 + $0x40] sm:$0xff] }
 0xcae   :  { %v1687_v30 = vpop.f32.mrb[16].mxu1 }
 0xcaf   :  { %v1691_v31 = vadd.f32 %v1687_v30, %v1121_v25  ;;  %v3418_v32 = vpop.f32.mrb[17].mxu1  ;;  %v4158_v25 = vpack.c.bf16 %v2008_v8, %v2007_v5  ;;  %v1806_v30 = vmax.f32 %v1782_v28, %v1805_v2  ;;  %v4173_v2 = vpack.c.bf16 %v2018_v58, %v2017_v50  ;;  %v2229_v50 = vld [vmem:[%s5496_s19 + $0x48] sm:$0xff] }
 0xcb0   :  { %v2009_v32 = vld [vmem:[%s5494_s15 + $0x10] sm:$0xff] }
 0xcb1   :  { %4271 = vtanh.f32 %v1691_v31  ;;  %v4161_v22 = vpack.c.bf16 %v2010_v33, %v2009_v32  ;;  %v1807_v44 = vrot.slane %v1806_v30, 2  ;;  %v2021_v32 = vld [vmem:[%s5494_s15 + $0x70] sm:$0xff]  ;;  %v2022_v33 = vld [vmem:[%s5494_s15 + $0x78] sm:$0xff] }
 0xcbb   :  { %v4272_v37 = vpop.eup %4271 }
 0xcbc   :  { %3452 = vmatmul.mubr.f32.vlgmr.msra.gmra.mrb[28].mxu0 %v4272_v37  ;;  %v5194_v38 = vsel %vm1698_vm1, %v4272_v37, %v1620_v54  ;;  %v1796_v37 = vmax.f32 %v1794_v0, %v1795_v13  ;;  %v2020_v13 = vld [vmem:[%s5494_s15 + $0x68] sm:$0xff] }
 0xcbd   :  { %4135 = vmatpush3.bf16.msra.mxu0 %v4134_v34  ;;  %3521 = vmatprep.mubr.msk.f32.mxu0 %vm4280_vm0, %v4281_v4 }
 0xcbe   :  { %4136 = vmatprep.subr.bf16.mxu0 %v4279_v3  ;;  %v1797_v16 = vrot.slane %v1796_v37, 1 }
 0xcc0   :  { %v1798_v43 = vmax.f32 %v1796_v37, %v1797_v16  ;;  %v2133_v16 = vld [vmem:[%s5495_s17 + $0x38] sm:$0xff] }
 0xcc1   :  { %4138 = vmatpush3.bf16.msra.mxu0 %v4137_v41  ;;  %v1817_v41 = vrot.slane %v1784_v21, 4 }
 0xcc2   :  { %4139 = vmatprep.subr.bf16.mxu0 %v4279_v3 }
 0xcc5   :  { %4141 = vmatpush3.bf16.msra.mxu0 %v4140_v46  ;;  %v2012_v46 = vld [vmem:[%s5494_s15 + $0x28] sm:$0xff] }
 0xcc6   :  { %4142 = vmatprep.subr.bf16.mxu0 %v4279_v3 }
 0xcc9   :  { %4144 = vmatpush3.bf16.msra.mxu0 %v4143_v51  ;;  %v1823_v51 = vrot.slane %v1785_v14, 4 }
 0xcca   :  { %4145 = vmatprep.subr.bf16.mxu0 %v4279_v3 }
 0xccb   :  { %v1824_v42 = vmax.f32 %v1785_v14, %v1823_v51  ;;  %v4179_v14 = vpack.c.bf16 %v2022_v33, %v2021_v32  ;;  %v2234_v32 = vld [vmem:[%s5496_s19 + $0x70] sm:$0xff]  ;;  %v26_v33 = vstv %s5498_s20 }
 0xccc   :  { %27 = vst [vmem:[#allocation2] sm:$0x1] %v26_v33 }
 0xccd   :  { %4147 = vmatpush3.bf16.msra.mxu0 %v4146_v63  ;;  %v1818_v63 = vmax.f32 %v1784_v21, %v1817_v41 }
 0xcce   :  { %4148 = vmatprep.subr.bf16.mxu0 %v4279_v3 }
 0xccf   :  { %v1819_v18 = vrot.slane %v1818_v63, 2 }
 0xcd1   :  { %4150 = vmatpush3.bf16.msra.mxu0 %v4149_v56  ;;  %v1808_v56 = vmax.f32 %v1806_v30, %v1807_v44  ;;  %v1820_v45 = vmax.f32 %v1818_v63, %v1819_v18  ;;  %v4176_v30 = vpack.c.bf16 %v2020_v13, %v2019_v12  ;;  %v2128_v44 = vld [vmem:[%s5495_s17 + $0x10] sm:$0xff]  ;;  %v2141_v18 = vld [vmem:[%s5495_s17 + $0x78] sm:$0xff] }
 0xcd2   :  { %4151 = vmatprep.subr.bf16.mxu0 %v4279_v3 }
 0xcd3   :  { %v1821_v20 = vrot.slane %v1820_v45, 1 }
 0xcd5   :  { %4153 = vmatpush3.bf16.msra.mxu0 %v4152_v23  ;;  %v2014_v23 = vld [vmem:[%s5494_s15 + $0x38] sm:$0xff]  ;;  %v1822_v24 = vmax.f32 %v1820_v45, %v1821_v20  ;;  %v2225_v45 = vld [vmem:[%s5496_s19 + $0x28] sm:$0xff] }
 0xcd6   :  { %4154 = vmatprep.subr.bf16.mxu0 %v4279_v3 }
 0xcd9   :  { %4156 = vmatpush3.bf16.msra.mxu0 %v4155_v6  ;;  %v1792_v6 = vmax.f32 %v1790_v36, %v1791_v52  ;;  %v2132_v52 = vld [vmem:[%s5495_s17 + $0x30] sm:$0xff] }
 0xcda   :  { %4181 = vmatprep.subr.bf16.mxu0 %v4279_v3  ;;  %v4191_v63 = vpack.c.bf16 %v2133_v16, %v2132_v52 }
 0xcdb   :  { %v2032_v49 = vsel %vm2031_vm3, %v1798_v43, %v1792_v6  ;;  %v2140_v43 = vld [vmem:[%s5495_s17 + $0x70] sm:$0xff] }
 0xcdc   :  { %3522 = vmatmul.mubr.f32.vlgmr.msra.gmra.mrb[30].mxu0 %v5023_v27  ;;  %v1864_v27 = vld [vmem:[%s5491_s14 + $0x68] sm:$0xff] }
 0xcdd   :  { %3591 = vmatprep.mubr.msk.f32.mxu0 %vm4280_vm0, %v4281_v4  ;;  %v4128_v61 = vpack.c.bf16 %v1864_v27, %v1863_v60  ;;  %v4167_v60 = vpack.c.bf16 %v2014_v23, %v2013_v15  ;;  %v1809_v27 = vrot.slane %v1808_v56, 1  ;;  %v2137_v15 = vld [vmem:[%s5495_s17 + $0x58] sm:$0xff] }
 0xcdf   :  { %4129 = vmatpush3.bf16.msra.mxu1 %v4128_v61  ;;  %v1830_v61 = vmax.f32 %v1786_v47, %v1829_v17  ;;  %v2136_v17 = vld [vmem:[%s5495_s17 + $0x50] sm:$0xff] }
 0xce0   :  { %4130 = vmatprep.subr.bf16.mxu1 %v4279_v3  ;;  %v4197_v23 = vpack.c.bf16 %v2137_v15, %v2136_v17 }
 0xce1   :  { %v1831_v29 = vrot.slane %v1830_v61, 2 }
 0xce3   :  { %4132 = vmatpush3.bf16.msra.mxu1 %v4131_v19  ;;  %v1804_v19 = vmax.f32 %v1802_v48, %v1803_v35  ;;  %v1832_v5 = vmax.f32 %v1830_v61, %v1831_v29  ;;  %v2131_v48 = vld [vmem:[%s5495_s17 + $0x28] sm:$0xff]  ;;  %v2138_v35 = vld [vmem:[%s5495_s17 + $0x60] sm:$0xff]  ;;  %v2222_v61 = vld [vmem:[%s5496_s19 + $0x10] sm:$0xff] }
 0xce4   :  { %4157 = vmatprep.subr.bf16.mxu1 %v4279_v3  ;;  %v2228_v29 = vld [vmem:[%s5496_s19 + $0x40] sm:$0xff] }
 0xce5   :  { %v2034_v39 = vsel %vm2033_vm4, %v1804_v19, %v2032_v49  ;;  %v4218_v58 = vpack.c.bf16 %v2229_v50, %v2228_v29 }
 0xd8f   :  { %v1766_v7 = vpop.f32.mrb[28].mxu0 }
 0xd90   :  { %v1770_v54 = vadd.f32 %v1766_v7, %v1126_v40  ;;  %v3453_v57 = vpop.f32.mrb[29].mxu0  ;;  %v1825_v40 = vrot.slane %v1824_v42, 2  ;;  %v1815_v7 = vrot.slane %v1814_v59, 1 }
 0xd91   :  { %v1810_v57 = vmax.f32 %v1808_v56, %v1809_v27  ;;  %v2221_v27 = vld [vmem:[%s5496_s19 + $0x8] sm:$0xff] }
 0xd92   :  { %4273 = vtanh.f32 %v1770_v54  ;;  %v4170_v54 = vpack.c.bf16 %v2016_v11, %v2015_v62  ;;  %v1826_v28 = vmax.f32 %v1824_v42, %v1825_v40  ;;  %v1816_v0 = vmax.f32 %v1814_v59, %v1815_v7  ;;  %v2139_v42 = vld [vmem:[%s5495_s17 + $0x68] sm:$0xff]  ;;  %v2223_v11 = vld [vmem:[%s5496_s19 + $0x18] sm:$0xff]  ;;  %v2224_v40 = vld [vmem:[%s5496_s19 + $0x20] sm:$0xff] }
 0xd93   :  { %v2036_v8 = vsel %vm2035_vm5, %v1810_v57, %v2034_v39  ;;  %v4200_v6 = vpack.c.bf16 %v2139_v42, %v2138_v35  ;;  %v4203_v59 = vpack.c.bf16 %v2141_v18, %v2140_v43  ;;  %v4209_v19 = vpack.c.bf16 %v2223_v11, %v2222_v61  ;;  %v2226_v7 = vld [vmem:[%s5496_s19 + $0x30] sm:$0xff]  ;;  %v2231_v39 = vld [vmem:[%s5496_s19 + $0x58] sm:$0xff] }
 0xd94   :  { %v1827_v21 = vrot.slane %v1826_v28, 1  ;;  %v4212_v49 = vpack.c.bf16 %v2225_v45, %v2224_v40 }
 0xd96   :  { %v1828_v9 = vmax.f32 %v1826_v28, %v1827_v21  ;;  %v2230_v28 = vld [vmem:[%s5496_s19 + $0x50] sm:$0xff]  ;;  %v2329_v21 = vld [vmem:[%s5497_s16] ss:$0 sm:$0xff] }
 0xd97   :  { %v4221_v20 = vpack.c.bf16 %v2231_v39, %v2230_v28 }
 0xd9c   :  { %v4274_v31 = vpop.eup %4273 }
 0xd9d   :  { %v1778_v34 = vsel %vm1777_vm2, %v4274_v31, %v5194_v38  ;;  %v2011_v38 = vld [vmem:[%s5494_s15 + $0x20] sm:$0xff]  ;;  %v1833_v31 = vrot.slane %v1832_v5, 1 }
 0xd9e   :  { %3487 = vmatmul.mubr.f32.vlgmr.msra.gmra.mrb[18].mxu1 %v1778_v34  ;;  %v4164_v55 = vpack.c.bf16 %v2012_v46, %v2011_v38  ;;  %v2129_v46 = vld [vmem:[%s5495_s17 + $0x18] sm:$0xff] }
 0xd9f   :  { %4159 = vmatpush3.bf16.msra.mxu1 %v4158_v25  ;;  %3556 = vmatprep.mubr.msk.f32.mxu1 %vm4280_vm0, %v4281_v4  ;;  %v2038_v25 = vsel %vm2037_vm6, %v1816_v0, %v2036_v8  ;;  %v1834_v36 = vmax.f32 %v1832_v5, %v1833_v31  ;;  %v4185_v47 = vpack.c.bf16 %v2129_v46, %v2128_v44  ;;  %v2232_v0 = vld [vmem:[%s5496_s19 + $0x60] sm:$0xff] }
 0xda0   :  { %4160 = vmatprep.subr.bf16.mxu1 %v4279_v3  ;;  %v2040_v34 = vsel %vm2039_vm7, %v1822_v24, %v2038_v25 }
 0xda1   :  { %v2042_v37 = vsel %vm2041_vm8, %v1828_v9, %v2040_v34  ;;  %v2330_v9 = vld [vmem:[%s5499_s18] ss:$0 sm:$0xff] }
 0xda2   :  { %v2044_v41 = vsel %vm2043_vm9, %v1834_v36, %v2042_v37 }
 0xda3   :  { %4162 = vmatpush3.bf16.msra.mxu1 %v4161_v22  ;;  %v2127_v22 = vld [vmem:[%s5495_s17 + $0x8] sm:$0xff] }
 0xda4   :  { %4163 = vmatprep.subr.bf16.mxu1 %v4279_v3  ;;  %v4182_v38 = vpack.c.bf16 %v2127_v22, %v2126_v26 }
 0xda6   :  { %4183 = vmatpush3.bf16.msra.mxu0 %v4182_v38 }
 0xda7   :  { %4165 = vmatpush3.bf16.msra.mxu1 %v4164_v55  ;;  %4184 = vmatprep.subr.bf16.mxu0 %v4279_v3  ;;  %v2135_v55 = vld [vmem:[%s5495_s17 + $0x48] sm:$0xff] }
 0xda8   :  { %4166 = vmatprep.subr.bf16.mxu1 %v4279_v3  ;;  %v4194_v56 = vpack.c.bf16 %v2135_v55, %v2134_v53 }
 0xdaa   :  { %4186 = vmatpush3.bf16.msra.mxu0 %v4185_v47 }
 0xdab   :  { %4168 = vmatpush3.bf16.msra.mxu1 %v4167_v60  ;;  %4187 = vmatprep.subr.bf16.mxu0 %v4279_v3  ;;  %v2220_v60 = vld [vmem:[%s5496_s19] sm:$0xff] }
 0xdac   :  { %4169 = vmatprep.subr.bf16.mxu1 %v4279_v3  ;;  %v4206_v62 = vpack.c.bf16 %v2221_v27, %v2220_v60 }
 0xdaf   :  { %v5336_v1 = vpop.f32.mrb[30].mxu0  ;;  %4171 = vmatpush3.bf16.msra.mxu1 %v4170_v54  ;;  %v2227_v54 = vld [vmem:[%s5496_s19 + $0x38] sm:$0xff] }
 0xdb0   :  { %v3523_v10 = vpop.f32.mrb[31].mxu0  ;;  %4172 = vmatprep.subr.bf16.mxu1 %v4279_v3  ;;  %v4215_v57 = vpack.c.bf16 %v2227_v54, %v2226_v7 }
 0xdb3   :  { %4174 = vmatpush3.bf16.msra.mxu1 %v4173_v2  ;;  %v2233_v2 = vld [vmem:[%s5496_s19 + $0x68] sm:$0xff] }
 0xdb4   :  { %4175 = vmatprep.subr.bf16.mxu1 %v4279_v3  ;;  %v4224_v5 = vpack.c.bf16 %v2233_v2, %v2232_v0 }
 0xdb7   :  { %4177 = vmatpush3.bf16.msra.mxu1 %v4176_v30 }
 0xdb8   :  { %4178 = vmatprep.subr.bf16.mxu1 %v4279_v3 }
 0xdbb   :  { %4180 = vmatpush3.bf16.msra.mxu1 %v4179_v14 }
 0xdbc   :  { %4205 = vmatprep.subr.bf16.mxu1 %v4279_v3 }
 0xdbe   :  { %3557 = vmatmul.mubr.f32.vlgmr.msra.gmra.mrb[20].mxu1 %v2044_v41  ;;  %v2331_v41 = vld [vmem:[#allocation2] ss:$0 sm:$0xff] }
 0xdbf   :  { %3626 = vmatprep.mubr.msk.f32.mxu1 %vm4280_vm0, %v4281_v4  ;;  %v2130_v4 = vld [vmem:[%s5495_s17 + $0x20] sm:$0xff]  ;;  %4207 = vmatpush3.bf16.msra.mxu1 %v4206_v62  ;;  %vm2319_vm0 = vcmask 7168  }
 0xdc0   :  { %v4188_v51 = vpack.c.bf16 %v2131_v48, %v2130_v4  ;;  %4208 = vmatprep.subr.bf16.mxu1 %v4279_v3 }
 0xdc2   :  { %4189 = vmatpush3.bf16.msra.mxu0 %v4188_v51 }
 0xdc3   :  { %4190 = vmatprep.subr.bf16.mxu0 %v4279_v3  ;;  %4210 = vmatpush3.bf16.msra.mxu1 %v4209_v19 }
 0xdc4   :  { %4211 = vmatprep.subr.bf16.mxu1 %v4279_v3 }
 0xdc6   :  { %4192 = vmatpush3.bf16.msra.mxu0 %v4191_v63 }
 0xdc7   :  { %4193 = vmatprep.subr.bf16.mxu0 %v4279_v3  ;;  %4213 = vmatpush3.bf16.msra.mxu1 %v4212_v49 }
 0xdc8   :  { %4214 = vmatprep.subr.bf16.mxu1 %v4279_v3 }
 0xdca   :  { %4195 = vmatpush3.bf16.msra.mxu0 %v4194_v56 }
 0xdcb   :  { %4196 = vmatprep.subr.bf16.mxu0 %v4279_v3  ;;  %4216 = vmatpush3.bf16.msra.mxu1 %v4215_v57 }
 0xdcc   :  { %4217 = vmatprep.subr.bf16.mxu1 %v4279_v3 }
 0xdce   :  { %4198 = vmatpush3.bf16.msra.mxu0 %v4197_v23 }
 0xdcf   :  { %4199 = vmatprep.subr.bf16.mxu0 %v4279_v3  ;;  %4219 = vmatpush3.bf16.msra.mxu1 %v4218_v58 }
 0xdd0   :  { %4220 = vmatprep.subr.bf16.mxu1 %v4279_v3 }
 0xdd2   :  { %4201 = vmatpush3.bf16.msra.mxu0 %v4200_v6 }
 0xdd3   :  { %4202 = vmatprep.subr.bf16.mxu0 %v4279_v3  ;;  %4222 = vmatpush3.bf16.msra.mxu1 %v4221_v20 }
 0xdd4   :  { %4223 = vmatprep.subr.bf16.mxu1 %v4279_v3 }
 0xdd6   :  { %4204 = vmatpush3.bf16.msra.mxu0 %v4203_v59 }
 0xdd7   :  { %4225 = vmatpush3.bf16.msra.mxu1 %v4224_v5 }
 0xdd8   :  { %4226 = vmatprep.subr.bf16.mxu1 %v4279_v3  ;;  %v2235_v3 = vld [vmem:[%s5496_s19 + $0x78] sm:$0xff] }
 0xe71   :  { %v1933_v8 = vpop.f32.mrb[18].mxu1 }
 0xe72   :  { %v2004_v10 = vadd.f32 %v5336_v1, %v1933_v8  ;;  %v3488_v12 = vpop.f32.mrb[19].mxu1  ;;  %v4227_v1 = vpack.c.bf16 %v2235_v3, %v2234_v32 }
 0xe74   :  { %4228 = vmatpush3.bf16.msra.mxu1 %v4227_v1 }
 0xe91   :  { %v2112_v13 = vpop.f32.mrb[20].mxu1 }
 0xe92   :  { %v2116_v24 = vadd.f32 %v2112_v13, %v2004_v10  ;;  %v3558_v25 = vpop.f32.mrb[21].mxu1 }
 0xe94   :  { %v2124_v30 = vadd.f32 %v2329_v21, %v2116_v24 }
 0xe96   :  { %v2125_v31 = vmax.f32 %v2124_v30, 0.0 }
 0xe98   :  { %3592 = vmatmul.mubr.f32.vlgmr.msra.gmra.mrb[32].mxu0 %v2125_v31 }
 0xf6b   :  { %v2215_v34 = vpop.f32.mrb[32].mxu0 }
 0xf6c   :  { %v2216_v14 = vadd.f32 %v2330_v9, %v2215_v34  ;;  %v3593_v36 = vpop.f32.mrb[33].mxu0 }
 0xf6e   :  { %v2219_v37 = vmax.f32 %v2216_v14, 0.0 }
 0xf70   :  { %3627 = vmatmul.mubr.f32.vlgmr.msra.gmra.mrb[22].mxu1 %v2219_v37 }
0x1043   :  { %v2309_v26 = vpop.f32.mrb[22].mxu1 }
0x1044   :  { %v2310_v22 = vadd.f32 %v2331_v41, %v2309_v26  ;;  %v3628_v44 = vpop.f32.mrb[23].mxu1 }
0x1046   :  { %v2332_v38 = vmul.f32 -1.442695, %v2310_v22 }
0x1048   :  { %4275 = vpow2.f32 %v2332_v38 }
0x1052   :  { %v4276_v46 = vpop.eup %4275 }
0x1053   :  { %v2316_v47 = vadd.f32 1.0, %v4276_v46 }
0x1055   :  { %4277 = vrcp.f32 %v2316_v47 }
0x105f   :  { %v4278_v4 = vpop.eup %4277 }
0x1060   :  { %2320 = vst.msk [vmem:[%s5500_s21] sm:$0xff] %vm2319_vm0, %v4278_v4 }

</bundles_post_ra>
